<compile_context>
chip_gen: v7x
topology: tpu7x:2x2x1
jax: 0.10.0
libtpu: 0.0.40
codegen_flags: <defaults>
</compile_context>

<pallas_src>
import math
import functools

import jax
import jax.numpy as jnp
from jax import lax
from jax.experimental import pallas as pl
from jax.experimental.pallas import tpu as pltpu


def _layernorm(x, w, b, eps=1e-5):
    mu = jnp.mean(x, axis=-1, keepdims=True)
    var = jnp.mean((x - mu) ** 2, axis=-1, keepdims=True)
    return (x - mu) * lax.rsqrt(var + eps) * w + b


def decoder_block_kernel(
    ev_ref,                                              # SMEM (B,) i32 scalar-prefetched enc_valid_lens
    x_ref, enc_ref,                                      # (1,T,D), (1,Te,D) f32
    wq1_ref, wk1_ref, wv1_ref, wo1_ref,                  # (D,D) f32
    wq2_ref, wk2_ref, wv2_ref, wo2_ref,                  # (D,D) f32
    ln1w_ref, ln1b_ref, ln2w_ref, ln2b_ref, ln3w_ref, ln3b_ref,   # (1,D) f32
    w1_ref, b1_ref, w2_ref, b2_ref,                      # (D,F),(1,F),(F,D),(1,D) f32
    o_ref,                                               # (1,T,D) f32
    *, num_heads, matmul_dtype):
    b = pl.program_id(0)
    _, T, D = x_ref.shape
    Te = enc_ref.shape[1]
    H = num_heads
    hd = D // H
    scale = 1.0 / math.sqrt(hd)
    exact = jnp.dtype(matmul_dtype) == jnp.dtype(jnp.float32)

    def cast(a):
        return a.astype(matmul_dtype)

    x = x_ref[0]       # (T, D) f32
    enc = enc_ref[0]   # (Te, D) f32

    # ---- masks built in-kernel (no HBM mask traffic) ----
    q_pos = lax.broadcasted_iota(jnp.int32, (T, T), 0)
    k_pos = lax.broadcasted_iota(jnp.int32, (T, T), 1)
    causal_keep = k_pos <= q_pos                         # (T, T)  self-attn: dec_valid_lens = [1..T]
    ev = ev_ref[b]                                       # scalar from SMEM
    ek_pos = lax.broadcasted_iota(jnp.int32, (T, Te), 1)
    cross_keep = ek_pos < ev                             # (T, Te) cross-attn: key < enc_valid_lens[b]

    def mha(q_in, kv_in, wq_ref, wk_ref, wv_ref, wo_ref, keep):
        # masked_softmax semantics: masked scores are replaced by -1e6 before softmax.
        q = jnp.dot(cast(q_in), cast(wq_ref[...]),
                    preferred_element_type=jnp.float32) * scale   # scale folded once
        k = jnp.dot(cast(kv_in), cast(wk_ref[...]),
                    preferred_element_type=jnp.float32)
        v = jnp.dot(cast(kv_in), cast(wv_ref[...]),
                    preferred_element_type=jnp.float32)
        qc, kc, vc = cast(q), cast(k), cast(v)           # hoisted out of the head loop
        heads = []
        # TODO(synk): for large H (>= 8) make head a grid axis / fori_loop to bound live
        # ranges; static unroll is fine at H=2.
        for h in range(H):
            sl = slice(h * hd, (h + 1) * hd)
            # (T, Tk) scores, contracting over head_dim only (no full-D waste).
            scores = lax.dot_general(qc[:, sl], kc[:, sl], (((1,), (1,)), ((), ())),
                                     preferred_element_type=jnp.float32)
            scores = jnp.where(keep, scores, -1000000.0)
            scores = scores - jnp.max(scores, axis=-1, keepdims=True)
            p = jnp.exp(scores)
            denom = jnp.sum(p, axis=-1, keepdims=True)
            if exact:
                p = p / denom                                  # bit-faithful f32 path
            else:
                p = p * pl.reciprocal(denom, approx=True)      # EUP, ~free on bf16 path
            heads.append(jnp.dot(cast(p), vc[:, sl],
                                 preferred_element_type=jnp.float32))
        out = jnp.concatenate(heads, axis=-1)            # (T, D), head order == torch concat
        return jnp.dot(cast(out), cast(wo_ref[...]),
                       preferred_element_type=jnp.float32)

    # ---- self-attention (causal) + add & norm ----
    x2 = mha(x, x, wq1_ref, wk1_ref, wv1_ref, wo1_ref, causal_keep)
    y = _layernorm(x + x2, ln1w_ref[...], ln1b_ref[...])

    # ---- cross-attention (enc_valid_lens) + add & norm ----
    y2 = mha(y, enc, wq2_ref, wk2_ref, wv2_ref, wo2_ref, cross_keep)
    z = _layernorm(y + y2, ln2w_ref[...], ln2b_ref[...])

    # ---- position-wise FFN + add & norm ----
    # TODO(synk): at production D/F tile these matmuls over a trailing "arbitrary"
    # reduction grid axis with a VMEM f32 accumulator instead of keeping w1/w2 resident
    # (v7x has only 64 MiB VMEM); at these toy sizes everything fits trivially.
    h1 = jnp.maximum(
        jnp.dot(cast(z), cast(w1_ref[...]), preferred_element_type=jnp.float32)
        + b1_ref[...], 0.0)
    f = (jnp.dot(cast(h1), cast(w2_ref[...]), preferred_element_type=jnp.float32)
         + b2_ref[...])
    o_ref[0] = _layernorm(z + f, ln3w_ref[...], ln3b_ref[...])


def transformer_decoder_block(x, enc_outputs, enc_valid_lens, params, num_heads,
                              state_kv=None, matmul_dtype=jnp.bfloat16):
    """Pallas implementation of TransformerDecoderBlock.forward (training mode).

    Returns (output, new_state_kv) where new_state_kv mimics state[2][i] = key_values.
    """
    B, T, D = x.shape
    Te = enc_outputs.shape[1]
    assert D % num_heads == 0

    # TODO(synk): incremental-decode path (state_kv is not None -> key_values longer than
    # T inside attention1, dec_valid_lens=None) is kept as pure-JAX glue; the kernel
    # implements the training-mode forward (key_values == x, causal mask).
    key_values = x if state_kv is None else jnp.concatenate([state_kv, x], axis=1)

    ev = enc_valid_lens.astype(jnp.int32)

    def vec(a):
        return a.reshape(1, -1)

    # Weights stay f32 here; the kernel casts them to the MXU dtype (no per-call
    # convert + HBM rewrite of all weights in the wrapper).
    args = [
        x.astype(jnp.float32), enc_outputs.astype(jnp.float32),
        params["wq1"], params["wk1"], params["wv1"], params["wo1"],
        params["wq2"], params["wk2"], params["wv2"], params["wo2"],
        vec(params["ln1w"]), vec(params["ln1b"]),
        vec(params["ln2w"]), vec(params["ln2b"]),
        vec(params["ln3w"]), vec(params["ln3b"]),
        params["w1"], vec(params["b1"]), params["w2"], vec(params["b2"]),
    ]

    # index_maps receive (batch_idx, *scalar_prefetch_refs) positionally.
    def per_batch(b, ev_ref):
        return (b, 0, 0)

    def resident(b, ev_ref):   # same block every step -> stays VMEM-resident
        return (0, 0)

    in_specs = (
        [pl.BlockSpec((1, T, D), per_batch),
         pl.BlockSpec((1, Te, D), per_batch)]
        + [pl.BlockSpec(a.shape, resident) for a in args[2:]]
    )

    kernel = functools.partial(decoder_block_kernel, num_heads=num_heads,
                               matmul_dtype=matmul_dtype)

    out = pl.pallas_call(
        kernel,
        out_shape=jax.ShapeDtypeStruct((B, T, D), jnp.float32),
        grid_spec=pltpu.PrefetchScalarGridSpec(
            num_scalar_prefetch=1,
            grid=(B,),
            in_specs=in_specs,
            out_specs=pl.BlockSpec((1, T, D), per_batch),
        ),
        compiler_params=pltpu.CompilerParams(
            dimension_semantics=("parallel",),
            # v5e's scoped default is only 16 MiB; re-derive per chip at production sizes.
            vmem_limit_bytes=32 * 1024 * 1024,
        ),
    )(ev, *args)
    return out, key_values


# ------------------------- pure-JAX reference for verification -------------------------
def ref_forward(x, enc, enc_valid, p, num_heads):
    B, T, D = x.shape
    hd = D // num_heads

    def split(a):
        Bq, Ta, _ = a.shape
        return a.reshape(Bq, Ta, num_heads, hd).transpose(0, 2, 1, 3)

    def mha(qin, kvin, wq, wk, wv, wo, valid_lens_2d):
        q, k, v = split(qin @ wq), split(kvin @ wk), split(kvin @ wv)
        scores = jnp.einsum("bhqd,bhkd->bhqk", q, k) / math.sqrt(hd)
        Tk = k.shape[2]
        col = jnp.arange(Tk)[None, None, None, :]
        mask = col < valid_lens_2d[:, None, :, None]
        scores = jnp.where(mask, scores, -1000000.0)
        w = jax.nn.softmax(scores, axis=-1)
        o = jnp.einsum("bhqk,bhkd->bhqd", w, v).transpose(0, 2, 1, 3).reshape(B, -1, D)
        return o @ wo

    def ln(xv, w, b):
        mu = xv.mean(-1, keepdims=True)
        var = ((xv - mu) ** 2).mean(-1, keepdims=True)
        return (xv - mu) / jnp.sqrt(var + 1e-5) * w + b

    dec_valid = jnp.broadcast_to(jnp.arange(1, T + 1)[None, :], (B, T))
    x2 = mha(x, x, p["wq1"], p["wk1"], p["wv1"], p["wo1"], dec_valid)
    y = ln(x + x2, p["ln1w"], p["ln1b"])
    enc_valid_2d = jnp.broadcast_to(enc_valid[:, None], (B, T))
    y2 = mha(y, enc, p["wq2"], p["wk2"], p["wv2"], p["wo2"], enc_valid_2d)
    z = ln(y + y2, p["ln2w"], p["ln2b"])
    f = jax.nn.relu(z @ p["w1"] + p["b1"]) @ p["w2"] + p["b2"]
    return ln(z + f, p["ln3w"], p["ln3b"])


if __name__ == "__main__":
    B, T, Te = 2, 8, 10         # batch, decoder seq, encoder seq
    D, F = 32, 64               # num_hiddens, ffn_num_hiddens
    NUM_HEADS = 2

    key = jax.random.PRNGKey(0)
    ks = jax.random.split(key, 16)

    def w(k, shape, scale=0.1):
        return scale * jax.random.normal(k, shape, dtype=jnp.float32)

    params = {
        # attention projection weights, stored (in, out) == PyTorch weight.T, bias=False
        "wq1": w(ks[0], (D, D)), "wk1": w(ks[1], (D, D)),
        "wv1": w(ks[2], (D, D)), "wo1": w(ks[3], (D, D)),
        "wq2": w(ks[4], (D, D)), "wk2": w(ks[5], (D, D)),
        "wv2": w(ks[6], (D, D)), "wo2": w(ks[7], (D, D)),
        # LayerNorm params (PyTorch defaults: weight=1, bias=0, eps=1e-5)
        "ln1w": jnp.ones((D,), jnp.float32), "ln1b": jnp.zeros((D,), jnp.float32),
        "ln2w": jnp.ones((D,), jnp.float32), "ln2b": jnp.zeros((D,), jnp.float32),
        "ln3w": jnp.ones((D,), jnp.float32), "ln3b": jnp.zeros((D,), jnp.float32),
        # FFN (LazyLinear with bias)
        "w1": w(ks[8], (D, F)), "b1": w(ks[9], (F,)),
        "w2": w(ks[10], (F, D)), "b2": w(ks[11], (D,)),
    }

    x = jax.random.normal(ks[12], (B, T, D), dtype=jnp.float32)
    enc_outputs = jax.random.normal(ks[13], (B, Te, D), dtype=jnp.float32)
    enc_valid_lens = jnp.array([5, 9], dtype=jnp.int32)

    ref = ref_forward(x, enc_outputs, enc_valid_lens, params, NUM_HEADS)

    # 1) exact-semantics path (f32 matmul operands, exact softmax divide)
    out_f32, new_kv = transformer_decoder_block(
        x, enc_outputs, enc_valid_lens, params, NUM_HEADS,
        state_kv=None, matmul_dtype=jnp.float32)
    out_f32 = jax.block_until_ready(out_f32)
    assert out_f32.shape == (B, T, D)
    assert jnp.allclose(out_f32, ref, rtol=2e-3, atol=2e-3), (
        "f32 kernel mismatch vs reference, max abs diff = %e"
        % float(jnp.max(jnp.abs(out_f32 - ref))))
    assert jnp.allclose(new_kv, x), "state key_values mismatch"

    # 2) fast path (bf16 MXU operands, f32 accumulation, approx reciprocal)
    out_bf16, _ = transformer_decoder_block(
        x, enc_outputs, enc_valid_lens, params, NUM_HEADS,
        state_kv=None, matmul_dtype=jnp.bfloat16)
    out_bf16 = jax.block_until_ready(out_bf16)
    assert jnp.allclose(out_bf16, ref, rtol=5e-2, atol=5e-2), (
        "bf16 kernel mismatch vs reference, max abs diff = %e"
        % float(jnp.max(jnp.abs(out_bf16 - ref))))

    print("KERNEL_OK")
</pallas_src>

<mosaic_0001>
module attributes {stable_mosaic.version = 11 : i64} {
  func.func @decoder_block_kernel(%arg0: i32, %arg1: memref<2xi32, #tpu.memory_space<smem>>, %arg2: memref<1x8x32xf32, #tpu.memory_space<vmem>>, %arg3: memref<1x10x32xf32, #tpu.memory_space<vmem>>, %arg4: memref<32x32xf32, #tpu.memory_space<vmem>>, %arg5: memref<32x32xf32, #tpu.memory_space<vmem>>, %arg6: memref<32x32xf32, #tpu.memory_space<vmem>>, %arg7: memref<32x32xf32, #tpu.memory_space<vmem>>, %arg8: memref<32x32xf32, #tpu.memory_space<vmem>>, %arg9: memref<32x32xf32, #tpu.memory_space<vmem>>, %arg10: memref<32x32xf32, #tpu.memory_space<vmem>>, %arg11: memref<32x32xf32, #tpu.memory_space<vmem>>, %arg12: memref<1x32xf32, #tpu.memory_space<vmem>>, %arg13: memref<1x32xf32, #tpu.memory_space<vmem>>, %arg14: memref<1x32xf32, #tpu.memory_space<vmem>>, %arg15: memref<1x32xf32, #tpu.memory_space<vmem>>, %arg16: memref<1x32xf32, #tpu.memory_space<vmem>>, %arg17: memref<1x32xf32, #tpu.memory_space<vmem>>, %arg18: memref<32x64xf32, #tpu.memory_space<vmem>>, %arg19: memref<1x64xf32, #tpu.memory_space<vmem>>, %arg20: memref<64x32xf32, #tpu.memory_space<vmem>>, %arg21: memref<1x32xf32, #tpu.memory_space<vmem>>, %arg22: memref<1x8x32xf32, #tpu.memory_space<vmem>>) attributes {dimension_semantics = [#tpu.dimension_semantics<parallel>], iteration_bounds = array<i64: 2>, scalar_prefetch = 1 : i64, scratch_operands = 0 : i64, tpu.core_type = #tpu.core_type<tc>, window_params = [{transform_indices = @transform_0, window_bounds = array<i64: 1, 8, 32>}, {transform_indices = @transform_1, window_bounds = array<i64: 1, 10, 32>}, {pipeline_mode = #tpu.pipeline_mode<synchronous>, transform_indices = @transform_2, window_bounds = array<i64: 32, 32>}, {pipeline_mode = #tpu.pipeline_mode<synchronous>, transform_indices = @transform_3, window_bounds = array<i64: 32, 32>}, {pipeline_mode = #tpu.pipeline_mode<synchronous>, transform_indices = @transform_4, window_bounds = array<i64: 32, 32>}, {pipeline_mode = #tpu.pipeline_mode<synchronous>, transform_indices = @transform_5, window_bounds = array<i64: 32, 32>}, {pipeline_mode = #tpu.pipeline_mode<synchronous>, transform_indices = @transform_6, window_bounds = array<i64: 32, 32>}, {pipeline_mode = #tpu.pipeline_mode<synchronous>, transform_indices = @transform_7, window_bounds = array<i64: 32, 32>}, {pipeline_mode = #tpu.pipeline_mode<synchronous>, transform_indices = @transform_8, window_bounds = array<i64: 32, 32>}, {pipeline_mode = #tpu.pipeline_mode<synchronous>, transform_indices = @transform_9, window_bounds = array<i64: 32, 32>}, {pipeline_mode = #tpu.pipeline_mode<synchronous>, transform_indices = @transform_10, window_bounds = array<i64: 1, 32>}, {pipeline_mode = #tpu.pipeline_mode<synchronous>, transform_indices = @transform_11, window_bounds = array<i64: 1, 32>}, {pipeline_mode = #tpu.pipeline_mode<synchronous>, transform_indices = @transform_12, window_bounds = array<i64: 1, 32>}, {pipeline_mode = #tpu.pipeline_mode<synchronous>, transform_indices = @transform_13, window_bounds = array<i64: 1, 32>}, {pipeline_mode = #tpu.pipeline_mode<synchronous>, transform_indices = @transform_14, window_bounds = array<i64: 1, 32>}, {pipeline_mode = #tpu.pipeline_mode<synchronous>, transform_indices = @transform_15, window_bounds = array<i64: 1, 32>}, {pipeline_mode = #tpu.pipeline_mode<synchronous>, transform_indices = @transform_16, window_bounds = array<i64: 32, 64>}, {pipeline_mode = #tpu.pipeline_mode<synchronous>, transform_indices = @transform_17, window_bounds = array<i64: 1, 64>}, {pipeline_mode = #tpu.pipeline_mode<synchronous>, transform_indices = @transform_18, window_bounds = array<i64: 64, 32>}, {pipeline_mode = #tpu.pipeline_mode<synchronous>, transform_indices = @transform_19, window_bounds = array<i64: 1, 32>}, {transform_indices = @transform_20, window_bounds = array<i64: 1, 8, 32>}]} {
    %c0 = arith.constant 0 : index
    %c0_0 = arith.constant 0 : index
    %c0_1 = arith.constant 0 : index
    %0 = vector.load %arg2[%c0, %c0_0, %c0_1] : memref<1x8x32xf32, #tpu.memory_space<vmem>>, vector<1x8x32xf32>
    %1 = vector.shape_cast %0 : vector<1x8x32xf32> to vector<8x32xf32>
    %c0_2 = arith.constant 0 : index
    %c0_3 = arith.constant 0 : index
    %c0_4 = arith.constant 0 : index
    %2 = vector.load %arg3[%c0_2, %c0_3, %c0_4] : memref<1x10x32xf32, #tpu.memory_space<vmem>>, vector<1x10x32xf32>
    %3 = vector.shape_cast %2 : vector<1x10x32xf32> to vector<10x32xf32>
    %4 = tpu.iota {dimensions = array<i32: 0>} : vector<8x8xi32>
    %5 = tpu.iota {dimensions = array<i32: 1>} : vector<8x8xi32>
    %6 = arith.cmpi sle, %5, %4 : vector<8x8xi32>
    %7 = arith.index_cast %arg0 : i32 to index
    %8 = memref.load %arg1[%7] : memref<2xi32, #tpu.memory_space<smem>>
    %9 = tpu.iota {dimensions = array<i32: 1>} : vector<8x10xi32>
    %10 = vector.broadcast %8 : i32 to vector<8x10xi32>
    %11 = arith.cmpi slt, %9, %10 : vector<8x10xi32>
    %c0_5 = arith.constant 0 : index
    %c0_6 = arith.constant 0 : index
    %12 = vector.load %arg4[%c0_5, %c0_6] : memref<32x32xf32, #tpu.memory_space<vmem>>, vector<32x32xf32>
    %cst = arith.constant dense<0.000000e+00> : vector<8x32xf32>
    %13 = tpu.matmul %1, %12, %cst {dimension_numbers = #tpu.dot_dimension_numbers<[1], [0], [0], [1], [0, 0, 1, 1], [], []>} : vector<8x32xf32>, vector<32x32xf32>, vector<8x32xf32> -> vector<8x32xf32>
    %cst_7 = arith.constant 2.500000e-01 : f32
    %14 = vector.broadcast %cst_7 : f32 to vector<8x32xf32>
    %15 = arith.mulf %13, %14 : vector<8x32xf32>
    %c0_8 = arith.constant 0 : index
    %c0_9 = arith.constant 0 : index
    %16 = vector.load %arg5[%c0_8, %c0_9] : memref<32x32xf32, #tpu.memory_space<vmem>>, vector<32x32xf32>
    %cst_10 = arith.constant dense<0.000000e+00> : vector<8x32xf32>
    %17 = tpu.matmul %1, %16, %cst_10 {dimension_numbers = #tpu.dot_dimension_numbers<[1], [0], [0], [1], [0, 0, 1, 1], [], []>} : vector<8x32xf32>, vector<32x32xf32>, vector<8x32xf32> -> vector<8x32xf32>
    %c0_11 = arith.constant 0 : index
    %c0_12 = arith.constant 0 : index
    %18 = vector.load %arg6[%c0_11, %c0_12] : memref<32x32xf32, #tpu.memory_space<vmem>>, vector<32x32xf32>
    %cst_13 = arith.constant dense<0.000000e+00> : vector<8x32xf32>
    %19 = tpu.matmul %1, %18, %cst_13 {dimension_numbers = #tpu.dot_dimension_numbers<[1], [0], [0], [1], [0, 0, 1, 1], [], []>} : vector<8x32xf32>, vector<32x32xf32>, vector<8x32xf32> -> vector<8x32xf32>
    %20 = vector.extract_strided_slice %15 {offsets = [0, 0], sizes = [8, 16], strides = [1, 1]} : vector<8x32xf32> to vector<8x16xf32>
    %21 = vector.extract_strided_slice %17 {offsets = [0, 0], sizes = [8, 16], strides = [1, 1]} : vector<8x32xf32> to vector<8x16xf32>
    %cst_14 = arith.constant dense<0.000000e+00> : vector<8x8xf32>
    %22 = tpu.matmul %20, %21, %cst_14 {dimension_numbers = #tpu.dot_dimension_numbers<[1], [1], [0], [0], [0, 0, 1, 0], [], []>} : vector<8x16xf32>, vector<8x16xf32>, vector<8x8xf32> -> vector<8x8xf32>
    %cst_15 = arith.constant -1.000000e+06 : f32
    %23 = vector.broadcast %cst_15 : f32 to vector<8x8xf32>
    %24 = arith.select %6, %22, %23 : vector<8x8xi1>, vector<8x8xf32>
    %cst_16 = arith.constant dense<0xFF800000> : vector<8xf32>
    %25 = vector.multi_reduction <maximumf>, %24, %cst_16 [1] : vector<8x8xf32> to vector<8xf32>
    %26 = vector.shape_cast %25 : vector<8xf32> to vector<8x1xf32>
    %27 = vector.broadcast %26 : vector<8x1xf32> to vector<8x8xf32>
    %28 = arith.subf %24, %27 : vector<8x8xf32>
    %29 = math.exp %28 : vector<8x8xf32>
    %cst_17 = arith.constant dense<0.000000e+00> : vector<8xf32>
    %30 = vector.multi_reduction <add>, %29, %cst_17 [1] : vector<8x8xf32> to vector<8xf32>
    %31 = vector.shape_cast %30 : vector<8xf32> to vector<8x1xf32>
    %32 = vector.broadcast %31 : vector<8x1xf32> to vector<8x8xf32>
    %33 = arith.divf %29, %32 : vector<8x8xf32>
    %34 = vector.extract_strided_slice %19 {offsets = [0, 0], sizes = [8, 16], strides = [1, 1]} : vector<8x32xf32> to vector<8x16xf32>
    %cst_18 = arith.constant dense<0.000000e+00> : vector<8x16xf32>
    %35 = tpu.matmul %33, %34, %cst_18 {dimension_numbers = #tpu.dot_dimension_numbers<[1], [0], [0], [1], [0, 0, 1, 1], [], []>} : vector<8x8xf32>, vector<8x16xf32>, vector<8x16xf32> -> vector<8x16xf32>
    %36 = vector.extract_strided_slice %15 {offsets = [0, 16], sizes = [8, 16], strides = [1, 1]} : vector<8x32xf32> to vector<8x16xf32>
    %37 = vector.extract_strided_slice %17 {offsets = [0, 16], sizes = [8, 16], strides = [1, 1]} : vector<8x32xf32> to vector<8x16xf32>
    %cst_19 = arith.constant dense<0.000000e+00> : vector<8x8xf32>
    %38 = tpu.matmul %36, %37, %cst_19 {dimension_numbers = #tpu.dot_dimension_numbers<[1], [1], [0], [0], [0, 0, 1, 0], [], []>} : vector<8x16xf32>, vector<8x16xf32>, vector<8x8xf32> -> vector<8x8xf32>
    %cst_20 = arith.constant -1.000000e+06 : f32
    %39 = vector.broadcast %cst_20 : f32 to vector<8x8xf32>
    %40 = arith.select %6, %38, %39 : vector<8x8xi1>, vector<8x8xf32>
    %cst_21 = arith.constant dense<0xFF800000> : vector<8xf32>
    %41 = vector.multi_reduction <maximumf>, %40, %cst_21 [1] : vector<8x8xf32> to vector<8xf32>
    %42 = vector.shape_cast %41 : vector<8xf32> to vector<8x1xf32>
    %43 = vector.broadcast %42 : vector<8x1xf32> to vector<8x8xf32>
    %44 = arith.subf %40, %43 : vector<8x8xf32>
    %45 = math.exp %44 : vector<8x8xf32>
    %cst_22 = arith.constant dense<0.000000e+00> : vector<8xf32>
    %46 = vector.multi_reduction <add>, %45, %cst_22 [1] : vector<8x8xf32> to vector<8xf32>
    %47 = vector.shape_cast %46 : vector<8xf32> to vector<8x1xf32>
    %48 = vector.broadcast %47 : vector<8x1xf32> to vector<8x8xf32>
    %49 = arith.divf %45, %48 : vector<8x8xf32>
    %50 = vector.extract_strided_slice %19 {offsets = [0, 16], sizes = [8, 16], strides = [1, 1]} : vector<8x32xf32> to vector<8x16xf32>
    %cst_23 = arith.constant dense<0.000000e+00> : vector<8x16xf32>
    %51 = tpu.matmul %49, %50, %cst_23 {dimension_numbers = #tpu.dot_dimension_numbers<[1], [0], [0], [1], [0, 0, 1, 1], [], []>} : vector<8x8xf32>, vector<8x16xf32>, vector<8x16xf32> -> vector<8x16xf32>
    %52 = tpu.concatenate %35, %51 in 1 : vector<8x16xf32>, vector<8x16xf32> -> vector<8x32xf32>
    %c0_24 = arith.constant 0 : index
    %c0_25 = arith.constant 0 : index
    %53 = vector.load %arg7[%c0_24, %c0_25] : memref<32x32xf32, #tpu.memory_space<vmem>>, vector<32x32xf32>
    %cst_26 = arith.constant dense<0.000000e+00> : vector<8x32xf32>
    %54 = tpu.matmul %52, %53, %cst_26 {dimension_numbers = #tpu.dot_dimension_numbers<[1], [0], [0], [1], [0, 0, 1, 1], [], []>} : vector<8x32xf32>, vector<32x32xf32>, vector<8x32xf32> -> vector<8x32xf32>
    %55 = arith.addf %1, %54 : vector<8x32xf32>
    %c0_27 = arith.constant 0 : index
    %c0_28 = arith.constant 0 : index
    %56 = vector.load %arg12[%c0_27, %c0_28] : memref<1x32xf32, #tpu.memory_space<vmem>>, vector<1x32xf32>
    %c0_29 = arith.constant 0 : index
    %c0_30 = arith.constant 0 : index
    %57 = vector.load %arg13[%c0_29, %c0_30] : memref<1x32xf32, #tpu.memory_space<vmem>>, vector<1x32xf32>
    %cst_31 = arith.constant dense<0.000000e+00> : vector<8xf32>
    %58 = vector.multi_reduction <add>, %55, %cst_31 [1] : vector<8x32xf32> to vector<8xf32>
    %59 = vector.shape_cast %58 : vector<8xf32> to vector<8x1xf32>
    %cst_32 = arith.constant 3.200000e+01 : f32
    %60 = vector.broadcast %cst_32 : f32 to vector<8x1xf32>
    %61 = arith.divf %59, %60 : vector<8x1xf32>
    %62 = vector.broadcast %61 : vector<8x1xf32> to vector<8x32xf32>
    %63 = arith.subf %55, %62 : vector<8x32xf32>
    %64 = arith.mulf %63, %63 : vector<8x32xf32>
    %cst_33 = arith.constant dense<0.000000e+00> : vector<8xf32>
    %65 = vector.multi_reduction <add>, %64, %cst_33 [1] : vector<8x32xf32> to vector<8xf32>
    %66 = vector.shape_cast %65 : vector<8xf32> to vector<8x1xf32>
    %cst_34 = arith.constant 3.200000e+01 : f32
    %67 = vector.broadcast %cst_34 : f32 to vector<8x1xf32>
    %68 = arith.divf %66, %67 : vector<8x1xf32>
    %69 = vector.broadcast %61 : vector<8x1xf32> to vector<8x32xf32>
    %70 = arith.subf %55, %69 : vector<8x32xf32>
    %cst_35 = arith.constant 9.99999974E-6 : f32
    %71 = vector.broadcast %cst_35 : f32 to vector<8x1xf32>
    %72 = arith.addf %68, %71 : vector<8x1xf32>
    %73 = math.rsqrt %72 : vector<8x1xf32>
    %74 = vector.broadcast %73 : vector<8x1xf32> to vector<8x32xf32>
    %75 = arith.mulf %70, %74 : vector<8x32xf32>
    %76 = vector.broadcast %56 : vector<1x32xf32> to vector<8x32xf32>
    %77 = arith.mulf %75, %76 : vector<8x32xf32>
    %78 = vector.broadcast %57 : vector<1x32xf32> to vector<8x32xf32>
    %79 = arith.addf %77, %78 : vector<8x32xf32>
    %c0_36 = arith.constant 0 : index
    %c0_37 = arith.constant 0 : index
    %80 = vector.load %arg8[%c0_36, %c0_37] : memref<32x32xf32, #tpu.memory_space<vmem>>, vector<32x32xf32>
    %cst_38 = arith.constant dense<0.000000e+00> : vector<8x32xf32>
    %81 = tpu.matmul %79, %80, %cst_38 {dimension_numbers = #tpu.dot_dimension_numbers<[1], [0], [0], [1], [0, 0, 1, 1], [], []>} : vector<8x32xf32>, vector<32x32xf32>, vector<8x32xf32> -> vector<8x32xf32>
    %cst_39 = arith.constant 2.500000e-01 : f32
    %82 = vector.broadcast %cst_39 : f32 to vector<8x32xf32>
    %83 = arith.mulf %81, %82 : vector<8x32xf32>
    %c0_40 = arith.constant 0 : index
    %c0_41 = arith.constant 0 : index
    %84 = vector.load %arg9[%c0_40, %c0_41] : memref<32x32xf32, #tpu.memory_space<vmem>>, vector<32x32xf32>
    %cst_42 = arith.constant dense<0.000000e+00> : vector<10x32xf32>
    %85 = tpu.matmul %3, %84, %cst_42 {dimension_numbers = #tpu.dot_dimension_numbers<[1], [0], [0], [1], [0, 0, 1, 1], [], []>} : vector<10x32xf32>, vector<32x32xf32>, vector<10x32xf32> -> vector<10x32xf32>
    %c0_43 = arith.constant 0 : index
    %c0_44 = arith.constant 0 : index
    %86 = vector.load %arg10[%c0_43, %c0_44] : memref<32x32xf32, #tpu.memory_space<vmem>>, vector<32x32xf32>
    %cst_45 = arith.constant dense<0.000000e+00> : vector<10x32xf32>
    %87 = tpu.matmul %3, %86, %cst_45 {dimension_numbers = #tpu.dot_dimension_numbers<[1], [0], [0], [1], [0, 0, 1, 1], [], []>} : vector<10x32xf32>, vector<32x32xf32>, vector<10x32xf32> -> vector<10x32xf32>
    %88 = vector.extract_strided_slice %83 {offsets = [0, 0], sizes = [8, 16], strides = [1, 1]} : vector<8x32xf32> to vector<8x16xf32>
    %89 = vector.extract_strided_slice %85 {offsets = [0, 0], sizes = [10, 16], strides = [1, 1]} : vector<10x32xf32> to vector<10x16xf32>
    %cst_46 = arith.constant dense<0.000000e+00> : vector<8x10xf32>
    %90 = tpu.matmul %88, %89, %cst_46 {dimension_numbers = #tpu.dot_dimension_numbers<[1], [1], [0], [0], [0, 0, 1, 0], [], []>} : vector<8x16xf32>, vector<10x16xf32>, vector<8x10xf32> -> vector<8x10xf32>
    %cst_47 = arith.constant -1.000000e+06 : f32
    %91 = vector.broadcast %cst_47 : f32 to vector<8x10xf32>
    %92 = arith.select %11, %90, %91 : vector<8x10xi1>, vector<8x10xf32>
    %cst_48 = arith.constant dense<0xFF800000> : vector<8xf32>
    %93 = vector.multi_reduction <maximumf>, %92, %cst_48 [1] : vector<8x10xf32> to vector<8xf32>
    %94 = vector.shape_cast %93 : vector<8xf32> to vector<8x1xf32>
    %95 = vector.broadcast %94 : vector<8x1xf32> to vector<8x10xf32>
    %96 = arith.subf %92, %95 : vector<8x10xf32>
    %97 = math.exp %96 : vector<8x10xf32>
    %cst_49 = arith.constant dense<0.000000e+00> : vector<8xf32>
    %98 = vector.multi_reduction <add>, %97, %cst_49 [1] : vector<8x10xf32> to vector<8xf32>
    %99 = vector.shape_cast %98 : vector<8xf32> to vector<8x1xf32>
    %100 = vector.broadcast %99 : vector<8x1xf32> to vector<8x10xf32>
    %101 = arith.divf %97, %100 : vector<8x10xf32>
    %102 = vector.extract_strided_slice %87 {offsets = [0, 0], sizes = [10, 16], strides = [1, 1]} : vector<10x32xf32> to vector<10x16xf32>
    %cst_50 = arith.constant dense<0.000000e+00> : vector<8x16xf32>
    %103 = tpu.matmul %101, %102, %cst_50 {dimension_numbers = #tpu.dot_dimension_numbers<[1], [0], [0], [1], [0, 0, 1, 1], [], []>} : vector<8x10xf32>, vector<10x16xf32>, vector<8x16xf32> -> vector<8x16xf32>
    %104 = vector.extract_strided_slice %83 {offsets = [0, 16], sizes = [8, 16], strides = [1, 1]} : vector<8x32xf32> to vector<8x16xf32>
    %105 = vector.extract_strided_slice %85 {offsets = [0, 16], sizes = [10, 16], strides = [1, 1]} : vector<10x32xf32> to vector<10x16xf32>
    %cst_51 = arith.constant dense<0.000000e+00> : vector<8x10xf32>
    %106 = tpu.matmul %104, %105, %cst_51 {dimension_numbers = #tpu.dot_dimension_numbers<[1], [1], [0], [0], [0, 0, 1, 0], [], []>} : vector<8x16xf32>, vector<10x16xf32>, vector<8x10xf32> -> vector<8x10xf32>
    %cst_52 = arith.constant -1.000000e+06 : f32
    %107 = vector.broadcast %cst_52 : f32 to vector<8x10xf32>
    %108 = arith.select %11, %106, %107 : vector<8x10xi1>, vector<8x10xf32>
    %cst_53 = arith.constant dense<0xFF800000> : vector<8xf32>
    %109 = vector.multi_reduction <maximumf>, %108, %cst_53 [1] : vector<8x10xf32> to vector<8xf32>
    %110 = vector.shape_cast %109 : vector<8xf32> to vector<8x1xf32>
    %111 = vector.broadcast %110 : vector<8x1xf32> to vector<8x10xf32>
    %112 = arith.subf %108, %111 : vector<8x10xf32>
    %113 = math.exp %112 : vector<8x10xf32>
    %cst_54 = arith.constant dense<0.000000e+00> : vector<8xf32>
    %114 = vector.multi_reduction <add>, %113, %cst_54 [1] : vector<8x10xf32> to vector<8xf32>
    %115 = vector.shape_cast %114 : vector<8xf32> to vector<8x1xf32>
    %116 = vector.broadcast %115 : vector<8x1xf32> to vector<8x10xf32>
    %117 = arith.divf %113, %116 : vector<8x10xf32>
    %118 = vector.extract_strided_slice %87 {offsets = [0, 16], sizes = [10, 16], strides = [1, 1]} : vector<10x32xf32> to vector<10x16xf32>
    %cst_55 = arith.constant dense<0.000000e+00> : vector<8x16xf32>
    %119 = tpu.matmul %117, %118, %cst_55 {dimension_numbers = #tpu.dot_dimension_numbers<[1], [0], [0], [1], [0, 0, 1, 1], [], []>} : vector<8x10xf32>, vector<10x16xf32>, vector<8x16xf32> -> vector<8x16xf32>
    %120 = tpu.concatenate %103, %119 in 1 : vector<8x16xf32>, vector<8x16xf32> -> vector<8x32xf32>
    %c0_56 = arith.constant 0 : index
    %c0_57 = arith.constant 0 : index
    %121 = vector.load %arg11[%c0_56, %c0_57] : memref<32x32xf32, #tpu.memory_space<vmem>>, vector<32x32xf32>
    %cst_58 = arith.constant dense<0.000000e+00> : vector<8x32xf32>
    %122 = tpu.matmul %120, %121, %cst_58 {dimension_numbers = #tpu.dot_dimension_numbers<[1], [0], [0], [1], [0, 0, 1, 1], [], []>} : vector<8x32xf32>, vector<32x32xf32>, vector<8x32xf32> -> vector<8x32xf32>
    %123 = arith.addf %79, %122 : vector<8x32xf32>
    %c0_59 = arith.constant 0 : index
    %c0_60 = arith.constant 0 : index
    %124 = vector.load %arg14[%c0_59, %c0_60] : memref<1x32xf32, #tpu.memory_space<vmem>>, vector<1x32xf32>
    %c0_61 = arith.constant 0 : index
    %c0_62 = arith.constant 0 : index
    %125 = vector.load %arg15[%c0_61, %c0_62] : memref<1x32xf32, #tpu.memory_space<vmem>>, vector<1x32xf32>
    %cst_63 = arith.constant dense<0.000000e+00> : vector<8xf32>
    %126 = vector.multi_reduction <add>, %123, %cst_63 [1] : vector<8x32xf32> to vector<8xf32>
    %127 = vector.shape_cast %126 : vector<8xf32> to vector<8x1xf32>
    %cst_64 = arith.constant 3.200000e+01 : f32
    %128 = vector.broadcast %cst_64 : f32 to vector<8x1xf32>
    %129 = arith.divf %127, %128 : vector<8x1xf32>
    %130 = vector.broadcast %129 : vector<8x1xf32> to vector<8x32xf32>
    %131 = arith.subf %123, %130 : vector<8x32xf32>
    %132 = arith.mulf %131, %131 : vector<8x32xf32>
    %cst_65 = arith.constant dense<0.000000e+00> : vector<8xf32>
    %133 = vector.multi_reduction <add>, %132, %cst_65 [1] : vector<8x32xf32> to vector<8xf32>
    %134 = vector.shape_cast %133 : vector<8xf32> to vector<8x1xf32>
    %cst_66 = arith.constant 3.200000e+01 : f32
    %135 = vector.broadcast %cst_66 : f32 to vector<8x1xf32>
    %136 = arith.divf %134, %135 : vector<8x1xf32>
    %137 = vector.broadcast %129 : vector<8x1xf32> to vector<8x32xf32>
    %138 = arith.subf %123, %137 : vector<8x32xf32>
    %cst_67 = arith.constant 9.99999974E-6 : f32
    %139 = vector.broadcast %cst_67 : f32 to vector<8x1xf32>
    %140 = arith.addf %136, %139 : vector<8x1xf32>
    %141 = math.rsqrt %140 : vector<8x1xf32>
    %142 = vector.broadcast %141 : vector<8x1xf32> to vector<8x32xf32>
    %143 = arith.mulf %138, %142 : vector<8x32xf32>
    %144 = vector.broadcast %124 : vector<1x32xf32> to vector<8x32xf32>
    %145 = arith.mulf %143, %144 : vector<8x32xf32>
    %146 = vector.broadcast %125 : vector<1x32xf32> to vector<8x32xf32>
    %147 = arith.addf %145, %146 : vector<8x32xf32>
    %c0_68 = arith.constant 0 : index
    %c0_69 = arith.constant 0 : index
    %148 = vector.load %arg18[%c0_68, %c0_69] : memref<32x64xf32, #tpu.memory_space<vmem>>, vector<32x64xf32>
    %cst_70 = arith.constant dense<0.000000e+00> : vector<8x64xf32>
    %149 = tpu.matmul %147, %148, %cst_70 {dimension_numbers = #tpu.dot_dimension_numbers<[1], [0], [0], [1], [0, 0, 1, 1], [], []>} : vector<8x32xf32>, vector<32x64xf32>, vector<8x64xf32> -> vector<8x64xf32>
    %c0_71 = arith.constant 0 : index
    %c0_72 = arith.constant 0 : index
    %150 = vector.load %arg19[%c0_71, %c0_72] : memref<1x64xf32, #tpu.memory_space<vmem>>, vector<1x64xf32>
    %151 = vector.broadcast %150 : vector<1x64xf32> to vector<8x64xf32>
    %152 = arith.addf %149, %151 : vector<8x64xf32>
    %cst_73 = arith.constant 0.000000e+00 : f32
    %153 = vector.broadcast %cst_73 : f32 to vector<8x64xf32>
    %154 = arith.maximumf %152, %153 : vector<8x64xf32>
    %c0_74 = arith.constant 0 : index
    %c0_75 = arith.constant 0 : index
    %155 = vector.load %arg20[%c0_74, %c0_75] : memref<64x32xf32, #tpu.memory_space<vmem>>, vector<64x32xf32>
    %cst_76 = arith.constant dense<0.000000e+00> : vector<8x32xf32>
    %156 = tpu.matmul %154, %155, %cst_76 {dimension_numbers = #tpu.dot_dimension_numbers<[1], [0], [0], [1], [0, 0, 1, 1], [], []>} : vector<8x64xf32>, vector<64x32xf32>, vector<8x32xf32> -> vector<8x32xf32>
    %c0_77 = arith.constant 0 : index
    %c0_78 = arith.constant 0 : index
    %157 = vector.load %arg21[%c0_77, %c0_78] : memref<1x32xf32, #tpu.memory_space<vmem>>, vector<1x32xf32>
    %158 = vector.broadcast %157 : vector<1x32xf32> to vector<8x32xf32>
    %159 = arith.addf %156, %158 : vector<8x32xf32>
    %160 = arith.addf %147, %159 : vector<8x32xf32>
    %c0_79 = arith.constant 0 : index
    %c0_80 = arith.constant 0 : index
    %161 = vector.load %arg16[%c0_79, %c0_80] : memref<1x32xf32, #tpu.memory_space<vmem>>, vector<1x32xf32>
    %c0_81 = arith.constant 0 : index
    %c0_82 = arith.constant 0 : index
    %162 = vector.load %arg17[%c0_81, %c0_82] : memref<1x32xf32, #tpu.memory_space<vmem>>, vector<1x32xf32>
    %cst_83 = arith.constant dense<0.000000e+00> : vector<8xf32>
    %163 = vector.multi_reduction <add>, %160, %cst_83 [1] : vector<8x32xf32> to vector<8xf32>
    %164 = vector.shape_cast %163 : vector<8xf32> to vector<8x1xf32>
    %cst_84 = arith.constant 3.200000e+01 : f32
    %165 = vector.broadcast %cst_84 : f32 to vector<8x1xf32>
    %166 = arith.divf %164, %165 : vector<8x1xf32>
    %167 = vector.broadcast %166 : vector<8x1xf32> to vector<8x32xf32>
    %168 = arith.subf %160, %167 : vector<8x32xf32>
    %169 = arith.mulf %168, %168 : vector<8x32xf32>
    %cst_85 = arith.constant dense<0.000000e+00> : vector<8xf32>
    %170 = vector.multi_reduction <add>, %169, %cst_85 [1] : vector<8x32xf32> to vector<8xf32>
    %171 = vector.shape_cast %170 : vector<8xf32> to vector<8x1xf32>
    %cst_86 = arith.constant 3.200000e+01 : f32
    %172 = vector.broadcast %cst_86 : f32 to vector<8x1xf32>
    %173 = arith.divf %171, %172 : vector<8x1xf32>
    %174 = vector.broadcast %166 : vector<8x1xf32> to vector<8x32xf32>
    %175 = arith.subf %160, %174 : vector<8x32xf32>
    %cst_87 = arith.constant 9.99999974E-6 : f32
    %176 = vector.broadcast %cst_87 : f32 to vector<8x1xf32>
    %177 = arith.addf %173, %176 : vector<8x1xf32>
    %178 = math.rsqrt %177 : vector<8x1xf32>
    %179 = vector.broadcast %178 : vector<8x1xf32> to vector<8x32xf32>
    %180 = arith.mulf %175, %179 : vector<8x32xf32>
    %181 = vector.broadcast %161 : vector<1x32xf32> to vector<8x32xf32>
    %182 = arith.mulf %180, %181 : vector<8x32xf32>
    %183 = vector.broadcast %162 : vector<1x32xf32> to vector<8x32xf32>
    %184 = arith.addf %182, %183 : vector<8x32xf32>
    %c0_88 = arith.constant 0 : index
    %c0_89 = arith.constant 0 : index
    %c0_90 = arith.constant 0 : index
    %185 = vector.load %arg22[%c0_88, %c0_89, %c0_90] : memref<1x8x32xf32, #tpu.memory_space<vmem>>, vector<1x8x32xf32>
    %186 = vector.shape_cast %185 : vector<1x8x32xf32> to vector<8x32xf32>
    %187 = vector.shape_cast %184 : vector<8x32xf32> to vector<1x8x32xf32>
    tpu.vector_store %arg22[%c0_88, %c0_89, %c0_90], %187 {strides = array<i32>} : memref<1x8x32xf32, #tpu.memory_space<vmem>>, vector<1x8x32xf32>,
    return
  }
  func.func @transform_0(%arg0: i32, %arg1: memref<2xi32, #tpu.memory_space<smem>>) -> (i32, i32, i32) {
    %c0_i32 = arith.constant 0 : i32
    %c0_i32_0 = arith.constant 0 : i32
    %c0_i32_1 = arith.constant 0 : i32
    return %arg0, %c0_i32, %c0_i32_0 : i32, i32, i32
  }
  func.func @transform_1(%arg0: i32, %arg1: memref<2xi32, #tpu.memory_space<smem>>) -> (i32, i32, i32) {
    %c0_i32 = arith.constant 0 : i32
    %c0_i32_0 = arith.constant 0 : i32
    %c0_i32_1 = arith.constant 0 : i32
    return %arg0, %c0_i32, %c0_i32_0 : i32, i32, i32
  }
  func.func @transform_2(%arg0: i32, %arg1: memref<2xi32, #tpu.memory_space<smem>>) -> (i32, i32) {
    %c0_i32 = arith.constant 0 : i32
    %c0_i32_0 = arith.constant 0 : i32
    %c0_i32_1 = arith.constant 0 : i32
    return %c0_i32, %c0_i32_0 : i32, i32
  }
  func.func @transform_3(%arg0: i32, %arg1: memref<2xi32, #tpu.memory_space<smem>>) -> (i32, i32) {
    %c0_i32 = arith.constant 0 : i32
    %c0_i32_0 = arith.constant 0 : i32
    %c0_i32_1 = arith.constant 0 : i32
    return %c0_i32, %c0_i32_0 : i32, i32
  }
  func.func @transform_4(%arg0: i32, %arg1: memref<2xi32, #tpu.memory_space<smem>>) -> (i32, i32) {
    %c0_i32 = arith.constant 0 : i32
    %c0_i32_0 = arith.constant 0 : i32
    %c0_i32_1 = arith.constant 0 : i32
    return %c0_i32, %c0_i32_0 : i32, i32
  }
  func.func @transform_5(%arg0: i32, %arg1: memref<2xi32, #tpu.memory_space<smem>>) -> (i32, i32) {
    %c0_i32 = arith.constant 0 : i32
    %c0_i32_0 = arith.constant 0 : i32
    %c0_i32_1 = arith.constant 0 : i32
    return %c0_i32, %c0_i32_0 : i32, i32
  }
  func.func @transform_6(%arg0: i32, %arg1: memref<2xi32, #tpu.memory_space<smem>>) -> (i32, i32) {
    %c0_i32 = arith.constant 0 : i32
    %c0_i32_0 = arith.constant 0 : i32
    %c0_i32_1 = arith.constant 0 : i32
    return %c0_i32, %c0_i32_0 : i32, i32
  }
  func.func @transform_7(%arg0: i32, %arg1: memref<2xi32, #tpu.memory_space<smem>>) -> (i32, i32) {
    %c0_i32 = arith.constant 0 : i32
    %c0_i32_0 = arith.constant 0 : i32
    %c0_i32_1 = arith.constant 0 : i32
    return %c0_i32, %c0_i32_0 : i32, i32
  }
  func.func @transform_8(%arg0: i32, %arg1: memref<2xi32, #tpu.memory_space<smem>>) -> (i32, i32) {
    %c0_i32 = arith.constant 0 : i32
    %c0_i32_0 = arith.constant 0 : i32
    %c0_i32_1 = arith.constant 0 : i32
    return %c0_i32, %c0_i32_0 : i32, i32
  }
  func.func @transform_9(%arg0: i32, %arg1: memref<2xi32, #tpu.memory_space<smem>>) -> (i32, i32) {
    %c0_i32 = arith.constant 0 : i32
    %c0_i32_0 = arith.constant 0 : i32
    %c0_i32_1 = arith.constant 0 : i32
    return %c0_i32, %c0_i32_0 : i32, i32
  }
  func.func @transform_10(%arg0: i32, %arg1: memref<2xi32, #tpu.memory_space<smem>>) -> (i32, i32) {
    %c0_i32 = arith.constant 0 : i32
    %c0_i32_0 = arith.constant 0 : i32
    %c0_i32_1 = arith.constant 0 : i32
    return %c0_i32, %c0_i32_0 : i32, i32
  }
  func.func @transform_11(%arg0: i32, %arg1: memref<2xi32, #tpu.memory_space<smem>>) -> (i32, i32) {
    %c0_i32 = arith.constant 0 : i32
    %c0_i32_0 = arith.constant 0 : i32
    %c0_i32_1 = arith.constant 0 : i32
    return %c0_i32, %c0_i32_0 : i32, i32
  }
  func.func @transform_12(%arg0: i32, %arg1: memref<2xi32, #tpu.memory_space<smem>>) -> (i32, i32) {
    %c0_i32 = arith.constant 0 : i32
    %c0_i32_0 = arith.constant 0 : i32
    %c0_i32_1 = arith.constant 0 : i32
    return %c0_i32, %c0_i32_0 : i32, i32
  }
  func.func @transform_13(%arg0: i32, %arg1: memref<2xi32, #tpu.memory_space<smem>>) -> (i32, i32) {
    %c0_i32 = arith.constant 0 : i32
    %c0_i32_0 = arith.constant 0 : i32
    %c0_i32_1 = arith.constant 0 : i32
    return %c0_i32, %c0_i32_0 : i32, i32
  }
  func.func @transform_14(%arg0: i32, %arg1: memref<2xi32, #tpu.memory_space<smem>>) -> (i32, i32) {
    %c0_i32 = arith.constant 0 : i32
    %c0_i32_0 = arith.constant 0 : i32
    %c0_i32_1 = arith.constant 0 : i32
    return %c0_i32, %c0_i32_0 : i32, i32
  }
  func.func @transform_15(%arg0: i32, %arg1: memref<2xi32, #tpu.memory_space<smem>>) -> (i32, i32) {
    %c0_i32 = arith.constant 0 : i32
    %c0_i32_0 = arith.constant 0 : i32
    %c0_i32_1 = arith.constant 0 : i32
    return %c0_i32, %c0_i32_0 : i32, i32
  }
  func.func @transform_16(%arg0: i32, %arg1: memref<2xi32, #tpu.memory_space<smem>>) -> (i32, i32) {
    %c0_i32 = arith.constant 0 : i32
    %c0_i32_0 = arith.constant 0 : i32
    %c0_i32_1 = arith.constant 0 : i32
    return %c0_i32, %c0_i32_0 : i32, i32
  }
  func.func @transform_17(%arg0: i32, %arg1: memref<2xi32, #tpu.memory_space<smem>>) -> (i32, i32) {
    %c0_i32 = arith.constant 0 : i32
    %c0_i32_0 = arith.constant 0 : i32
    %c0_i32_1 = arith.constant 0 : i32
    return %c0_i32, %c0_i32_0 : i32, i32
  }
  func.func @transform_18(%arg0: i32, %arg1: memref<2xi32, #tpu.memory_space<smem>>) -> (i32, i32) {
    %c0_i32 = arith.constant 0 : i32
    %c0_i32_0 = arith.constant 0 : i32
    %c0_i32_1 = arith.constant 0 : i32
    return %c0_i32, %c0_i32_0 : i32, i32
  }
  func.func @transform_19(%arg0: i32, %arg1: memref<2xi32, #tpu.memory_space<smem>>) -> (i32, i32) {
    %c0_i32 = arith.constant 0 : i32
    %c0_i32_0 = arith.constant 0 : i32
    %c0_i32_1 = arith.constant 0 : i32
    return %c0_i32, %c0_i32_0 : i32, i32
  }
  func.func @transform_20(%arg0: i32, %arg1: memref<2xi32, #tpu.memory_space<smem>>) -> (i32, i32, i32) {
    %c0_i32 = arith.constant 0 : i32
    %c0_i32_0 = arith.constant 0 : i32
    %c0_i32_1 = arith.constant 0 : i32
    return %arg0, %c0_i32, %c0_i32_0 : i32, i32, i32
  }
}

</mosaic_0001>

<bundles_post_ra>
// kernel: tpu_custom_call.1
= control target key start
LH: loop header
LB: loop body
LE: loop exit
PB: predicated region body
PF: predicated region fallthrough
CT: control target
= control target key end

     0   :  { %s4042_s0 = inlined_call_operand.vmem [shape: s32[2], index: 0, kind: input, shape index: {}]   ;;  %s4043_s1 = inlined_call_operand.hbm [shape: f32[2,8,32], index: 1, kind: input, shape index: {}]   ;;  %s4044_s2 = inlined_call_operand.vmem [shape: f32[2,10,32], index: 2, kind: input, shape index: {}]   ;;  %s4045_s3 = inlined_call_operand.vmem [shape: f32[32,32], index: 3, kind: input, shape index: {}]   ;;  %s4046_s4 = inlined_call_operand.vmem [shape: f32[32,32], index: 4, kind: input, shape index: {}]   ;;  %s4047_s5 = inlined_call_operand.vmem [shape: f32[32,32], index: 5, kind: input, shape index: {}]   ;;  %s4048_s6 = inlined_call_operand.vmem [shape: f32[32,32], index: 6, kind: input, shape index: {}]   ;;  %s4049_s7 = inlined_call_operand.hbm [shape: f32[32,32], index: 7, kind: input, shape index: {}]   ;;  %s4050_s8 = inlined_call_operand.hbm [shape: f32[32,32], index: 8, kind: input, shape index: {}]   ;;  %s4051_s9 = inlined_call_operand.hbm [shape: f32[32,32], index: 9, kind: input, shape index: {}]   ;;  %s4052_s10 = inlined_call_operand.hbm [shape: f32[32,32], index: 10, kind: input, shape index: {}]   ;;  %s4053_s11 = inlined_call_operand.hbm [shape: f32[1,32], index: 11, kind: input, shape index: {}]   ;;  %s4054_s12 = inlined_call_operand.hbm [shape: f32[1,32], index: 12, kind: input, shape index: {}]   ;;  %s4055_s13 = inlined_call_operand.vmem [shape: f32[1,32], index: 13, kind: input, shape index: {}]   ;;  %s4056_s14 = inlined_call_operand.vmem [shape: f32[1,32], index: 14, kind: input, shape index: {}]   ;;  %s4057_s15 = inlined_call_operand.vmem [shape: f32[1,32], index: 15, kind: input, shape index: {}]   ;;  %s4058_s16 = inlined_call_operand.vmem [shape: f32[1,32], index: 16, kind: input, shape index: {}]   ;;  %s4059_s17 = inlined_call_operand.vmem [shape: f32[32,64], index: 17, kind: input, shape index: {}]   ;;  %s4060_s18 = inlined_call_operand.vmem [shape: f32[1,64], index: 18, kind: input, shape index: {}]   ;;  %s4061_s19 = inlined_call_operand.vmem [shape: f32[64,32], index: 19, kind: input, shape index: {}]   ;;  %s4062_s20 = inlined_call_operand.vmem [shape: f32[1,32], index: 20, kind: input, shape index: {}]   ;;  %s4063_s21 = inlined_call_operand.hbm [shape: f32[2,8,32], index: 21, kind: output, shape index: {}]  }
   0x1   :  { %4076 = sst [smem:[#allocation23_spill]] %s4042_s0 }
   0x2   :  { %4077 = sst [smem:[#allocation24_spill]] %s4043_s1  ;;  %s4094_s26 = sld [smem:[#allocation23_spill]] }
   0x3   :  { %4078 = sst [smem:[#allocation25_spill]] %s4044_s2 }
   0x4   :  { %4079 = sst [smem:[#allocation26_spill]] %s4045_s3 }
   0x5   :  { %4080 = sst [smem:[#allocation27_spill]] %s4046_s4 }
   0x6   :  { %4081 = sst [smem:[#allocation28_spill]] %s4047_s5 }
   0x7   :  { %4082 = sst [smem:[#allocation29_spill]] %s4048_s6 }
   0x8   :  { %4083 = sst [smem:[#allocation30_spill]] %s4049_s7 }
   0x9   :  { %4084 = sst [smem:[#allocation31_spill]] %s4050_s8 }
   0xa   :  { %4085 = sst [smem:[#allocation32_spill]] %s4051_s9 }
   0xb   :  { %4086 = sst [smem:[#allocation33_spill]] %s4052_s10 }
   0xc   :  { %4087 = sst [smem:[#allocation34_spill]] %s4055_s13 }
   0xd   :  { %4088 = sst [smem:[#allocation35_spill]] %s4056_s14 }
   0xe   :  { %4089 = sst [smem:[#allocation36_spill]] %s4057_s15  ;;  %s26_s15 = sshll.u32 %s4094_s26, 4  ;;  %s27_s15 = int_to_ptr.vmem [resolvable:$true] %s26_s15 }
   0xf   :  { %4090 = sst [smem:[#allocation37_spill]] %s4058_s16  ;;  %s3031_s27 = scalar_lea.vmem %s27_s15, 16 }
  0x10   :  { %4091 = sst [smem:[#allocation38_spill]] %s4060_s18  ;;  %p3032_p0 = scmp.ne.s32.totalorder %s27_s15, %s3031_s27 }
  0x11   :  { %4092 = sst [smem:[#allocation39_spill]] %s4062_s20  ;;  %p3036_p1 = scmp.lt.s32.totalorder %s27_s15, %s27_s15 }
  0x12   :  { %4093 = sst [smem:[#allocation40_spill]] %s4063_s21  ;;  %p3037_p2 = scmp.lt.s32.totalorder %s3031_s27, %s3031_s27 }
  0x14   :  { %p3038_p3 = por %p3037_p2, %p3036_p1 }
  0x16   :  { %p3039_p4 = pnand %p3038_p3, %p3032_p0 }
  0x18   :  { %3042 = shalt.err (!%p3039_p4)  }
  0x19   :  { %s3323_s3 = smov [#allocation3]  }
  0x1a   :  { %29 = dma.vmem_to_smem %s27_s15, 16, %s3323_s3, [#allocation2] }
  0x1b   :  { %3285 = dma.done.wait [#allocation2], 16 }
  0x1c   :  { %3286 = vsyncadd [#allocation2], 4294967280 }
  0x1d   :  { %31 = sfence }
  0x1e   :  { %32 = vsyncpa [#allocation5], 0 }
  0x1f   :  { %34 = vsyncpa [#allocation5 + $0x1], 0 }
  0x20   :  { %35 = vsyncpa [#allocation8], 0 }
  0x21   :  { %36 = vsyncpa [#allocation11], 0 }
  0x22   :  { %37 = vsyncpa [#allocation14], 0 }
  0x23   :  { %38 = vsyncpa [#allocation6], 0 }
  0x24   :  { %40 = vsyncpa [#allocation6 + $0x1], 0  ;;  %s3453_s28 = smov 0   ;;  %s3455_s29 = smov 0  }
  0x25   :  { %s3457_s0 = smov 0   ;;  %s3459_s4 = smov 0  }
  0x26 LB: > { %s3324_s15 = smov [#allocation7]   ;;  %s3474_s5 = sadd.s32 4294967295, %s3321_s4   ;;  %s3321_s4 = sphi %s3459_s4, %s4142_s4   ;;  %s3317_s0 = sphi %s3457_s0, %s4141_s0   ;;  %s3313_s29 = sphi %s3455_s29, %s4140_s29   ;;  %s3309_s28 = sphi %s3453_s28, %s4139_s28  }
  0x27   : > { %s531_s30 = sshll.u32 %s3324_s15, 4  ;;  %p2493_p5 = scmp.ge.s32.totalorder %s3321_s4, 1  ;;  %s3479_s30 = int_to_ptr.vmem [resolvable:$true] %s531_s30 }
  0x28   : > { %p4071_p6 = scmp.eq.s32.totalorder %s3474_s5, 0  ;;  %p507_p7 = scmp.lt.s32.totalorder %s3321_s4, 3 }
  0x29   : > { %s3325_s23 = smov [#allocation10]   ;;  %s3326_s2 = smov [#allocation13]  }
  0x2a   : > { %p3481_p8 = pnand %p2493_p5, %p507_p7  ;;  %s557_s1 = sshll.u32 %s3325_s23, 4  ;;  %s3494_s1 = int_to_ptr.vmem [resolvable:$true] %s557_s1 }
  0x2b   : > { %s584_s25 = sshll.u32 %s3326_s2, 4  ;;  %s4097_s7 = sld [smem:[#allocation30_spill]]  ;;  %s3496_s25 = int_to_ptr.vmem [resolvable:$true] %s584_s25 }
  0x2c   : > { %s4095_s22 = scalar_select %p3481_p8, 1, 0 }
  0x2d   : > { %p2911_p10 = pneg %p3481_p8 }
  0x2f   : > { %p3490_p11 = pnand %p2911_p10, %p4071_p6 }
  0x31   : > { %s3043_s3 = scalar_lea.hbm %s4097_s7, 512  ;;  %p3506_p13 = pneg %p3490_p11 }
  0x32   : > { %p3044_p12 = scmp.ne.s32.totalorder %s4097_s7, %s3043_s3  ;;  %p3050_p2 = scmp.lt.u32.totalorder %s3043_s3, %s4097_s7 }
  0x34   : > { %p3046_p0 = pnand %p3506_p13, %p3044_p12 }
  0x36   : > { %p3047_p1 = pneg %p3046_p0 }
  0x38   : > { %p3052_p3 = pnand %p3050_p2, %p3047_p1 }
  0x3a   : > { %3055 = shalt.err (!%p3052_p3)
}
  0x3b   : > { %s3056_s21 = scalar_lea.vmem %s3479_s30, 512  ;;  %p3064_p10 = scmp.lt.s32.totalorder %s3479_s30, %s3479_s30 }
  0x3c   : > { %p3057_p4 = scmp.ne.s32.totalorder %s3479_s30, %s3056_s21  ;;  %p3065_p9 = scmp.lt.s32.totalorder %s3056_s21, %s3056_s21 }
  0x3e   : > { %p3059_p5 = pnand %p3057_p4, %p3506_p13  ;;  %p3066_p12 = por %p3065_p9, %p3064_p10 }
  0x40   : > { %p3060_p7 = pneg %p3059_p5 }
  0x42   : > { %p3067_p0 = pnand %p3066_p12, %p3060_p7 }
  0x44   : > { %3070 = shalt.err (!%p3067_p0)
}
  0x45   : > { %s4069_s26 = smov 128   ;;  %s3328_s16 = smov 8  }
  0x46   : > { %2914 = dma.hbm_to_vmem [thread:$0]  (!%p3490_p11), %s4097_s7, 512, %s3479_s30, [#allocation8], %s4069_s26, %s4069_s26, %s3328_s16  }
  0x47   : > { %s4099_s9 = sld [smem:[#allocation32_spill]] }
  0x4d   : > { %s3071_s21 = scalar_lea.hbm %s4099_s9, 512 }
  0x4e   : > { %p3072_p9 = scmp.ne.s32.totalorder %s4099_s9, %s3071_s21  ;;  %p3078_p3 = scmp.lt.u32.totalorder %s3071_s21, %s4099_s9 }
  0x50   : > { %p3074_p1 = pnand %p3072_p9, %p3506_p13 }
  0x52   : > { %p3075_p2 = pneg %p3074_p1 }
  0x54   : > { %p3080_p4 = pnand %p3078_p3, %p3075_p2 }
  0x56   : > { %3083 = shalt.err (!%p3080_p4)
}
  0x57   : > { %s3084_s30 = scalar_lea.vmem %s3494_s1, 512  ;;  %p3092_p12 = scmp.lt.s32.totalorder %s3494_s1, %s3494_s1 }
  0x58   : > { %p3085_p5 = scmp.ne.s32.totalorder %s3494_s1, %s3084_s30  ;;  %p3093_p0 = scmp.lt.s32.totalorder %s3084_s30, %s3084_s30 }
  0x5a   : > { %p3087_p7 = pnand %p3085_p5, %p3506_p13  ;;  %p3094_p9 = por %p3093_p0, %p3092_p12 }
  0x5c   : > { %p3088_p10 = pneg %p3087_p7 }
  0x5e   : > { %p3095_p1 = pnand %p3094_p9, %p3088_p10 }
  0x60   : > { %3098 = shalt.err (!%p3095_p1)
}
  0x61   : > { %2920 = dma.hbm_to_vmem [thread:$0]  (!%p3490_p11), %s4099_s9, 512, %s3494_s1, [#allocation11], %s4069_s26, %s4069_s26, %s3328_s16  }
  0x62   : > { %s3099_s27 = scalar_lea.hbm %s4053_s11, 16 }
  0x63   : > { %p3100_p2 = scmp.ne.s32.totalorder %s4053_s11, %s3099_s27  ;;  %p3106_p5 = scmp.lt.u32.totalorder %s3099_s27, %s4053_s11 }
  0x65   : > { %p3102_p3 = pnand %p3100_p2, %p3506_p13 }
  0x67   : > { %p3103_p4 = pneg %p3102_p3 }
  0x69   : > { %p3108_p7 = pnand %p3106_p5, %p3103_p4 }
  0x6b   : > { %3111 = shalt.err (!%p3108_p7)
}
  0x6c   : > { %s3112_s1 = scalar_lea.vmem %s3496_s25, 16  ;;  %s3119_s30 = scalar_lea.vmem %s3496_s25, 32 }
  0x6d   : > { %p3113_p10 = scmp.ne.s32.totalorder %s3496_s25, %s3112_s1  ;;  %p3120_p9 = scmp.lt.s32.totalorder %s3496_s25, %s3496_s25 }
  0x6e   : > { %p3121_p1 = scmp.lt.s32.totalorder %s3119_s30, %s3112_s1 }
  0x6f   : > { %p3115_p12 = pnand %p3113_p10, %p3506_p13 }
  0x70   : > { %p3122_p2 = por %p3121_p1, %p3120_p9 }
  0x71   : > { %p3116_p0 = pneg %p3115_p12 }
  0x73   : > { %p3123_p3 = pnand %p3122_p2, %p3116_p0 }
  0x75   : > { %3126 = shalt.err (!%p3123_p3)
}
  0x76   : > { %2926 = dma.hbm_to_vmem [thread:$0]  (!%p3490_p11), %s4053_s11, 16, %s3496_s25, [#allocation14]  }
  0x77   : > { %s3329_s18 = smov [#allocation9]   ;;  %s3330_s27 = smov [#allocation12]  }
  0x78   : > { %s544_s20 = sshll.u32 %s3329_s18, 4  ;;  %s570_s3 = sshll.u32 %s3330_s27, 4  ;;  %s545_s20 = int_to_ptr.vmem [resolvable:$true] %s544_s20  ;;  %s571_s3 = int_to_ptr.vmem [resolvable:$true] %s570_s3 }
  0x79   : > { %s4100_s8 = sld [smem:[#allocation31_spill]] }
  0x7f   : > { %s3127_s21 = scalar_lea.hbm %s4100_s8, 512 }
  0x80   : > { %p3128_p4 = scmp.ne.s32.totalorder %s4100_s8, %s3127_s21  ;;  %p3134_p10 = scmp.lt.u32.totalorder %s3127_s21, %s4100_s8 }
  0x82   : > { %p3130_p5 = pnand %p3128_p4, %p3506_p13 }
  0x84   : > { %p3131_p7 = pneg %p3130_p5 }
  0x86   : > { %p3136_p12 = pnand %p3134_p10, %p3131_p7 }
  0x88   : > { %3139 = shalt.err (!%p3136_p12)
}
  0x89   : > { %s3140_s25 = scalar_lea.vmem %s545_s20, 512  ;;  %p3148_p2 = scmp.lt.s32.totalorder %s545_s20, %s545_s20 }
  0x8a   : > { %p3141_p0 = scmp.ne.s32.totalorder %s545_s20, %s3140_s25  ;;  %p3149_p3 = scmp.lt.s32.totalorder %s3140_s25, %s3140_s25 }
  0x8c   : > { %p3143_p9 = pnand %p3141_p0, %p3506_p13  ;;  %p3150_p6 = por %p3149_p3, %p3148_p2 }
  0x8e   : > { %p3144_p1 = pneg %p3143_p9 }
  0x90   : > { %p3151_p8 = pnand %p3150_p6, %p3144_p1 }
  0x92   : > { %3154 = shalt.err (!%p3151_p8)
}
  0x93   : > { %s4101_s14 = smov 128   ;;  %s4102_s10 = sld [smem:[#allocation33_spill]] }
  0x94   : > { %2917 = dma.hbm_to_vmem [thread:$0]  (!%p3490_p11), %s4100_s8, 512, %s545_s20, [#allocation8], %s4101_s14, %s4101_s14, %s3328_s16  }
  0x99   : > { %s3155_s2 = scalar_lea.hbm %s4102_s10, 512 }
  0x9a   : > { %p3156_p6 = scmp.ne.s32.totalorder %s4102_s10, %s3155_s2  ;;  %p3162_p5 = scmp.lt.u32.totalorder %s3155_s2, %s4102_s10 }
  0x9c   : > { %p3158_p8 = pnand %p3156_p6, %p3506_p13 }
  0x9e   : > { %p3159_p4 = pneg %p3158_p8 }
  0xa0   : > { %p3164_p7 = pnand %p3162_p5, %p3159_p4 }
  0xa2   : > { %3167 = shalt.err (!%p3164_p7)
}
  0xa3   : > { %s3168_s25 = scalar_lea.vmem %s571_s3, 512  ;;  %p3176_p9 = scmp.lt.s32.totalorder %s571_s3, %s571_s3 }
  0xa4   : > { %p3169_p10 = scmp.ne.s32.totalorder %s571_s3, %s3168_s25  ;;  %p3177_p1 = scmp.lt.s32.totalorder %s3168_s25, %s3168_s25 }
  0xa6   : > { %p3171_p12 = pnand %p3169_p10, %p3506_p13  ;;  %p3178_p2 = por %p3177_p1, %p3176_p9 }
  0xa8   : > { %p3172_p0 = pneg %p3171_p12 }
  0xaa   : > { %p3179_p3 = pnand %p3178_p2, %p3172_p0 }
  0xac   : > { %3182 = shalt.err (!%p3179_p3)
}
  0xad   : > { %2923 = dma.hbm_to_vmem [thread:$0]  (!%p3490_p11), %s4102_s10, 512, %s571_s3, [#allocation11], %s4101_s14, %s4101_s14, %s3328_s16  }
  0xae   : > { %s3331_s18 = smov [#allocation15]   ;;  %s3183_s21 = scalar_lea.hbm %s4054_s12, 16 }
  0xaf   : > { %s595_s27 = sshll.u32 %s3331_s18, 4  ;;  %p3184_p6 = scmp.ne.s32.totalorder %s4054_s12, %s3183_s21  ;;  %s596_s27 = int_to_ptr.vmem [resolvable:$true] %s595_s27 }
  0xb0   : > { %p3190_p5 = scmp.lt.u32.totalorder %s3183_s21, %s4054_s12 }
  0xb1   : > { %p3186_p8 = pnand %p3184_p6, %p3506_p13 }
  0xb3   : > { %p3187_p4 = pneg %p3186_p8 }
  0xb5   : > { %p3192_p7 = pnand %p3190_p5, %p3187_p4 }
  0xb7   : > { %3195 = shalt.err (!%p3192_p7)
}
  0xb8   : > { %s3196_s16 = scalar_lea.vmem %s596_s27, 16  ;;  %s3203_s3 = scalar_lea.vmem %s596_s27, 32 }
  0xb9   : > { %p3197_p10 = scmp.ne.s32.totalorder %s596_s27, %s3196_s16  ;;  %p3204_p9 = scmp.lt.s32.totalorder %s596_s27, %s596_s27 }
  0xba   : > { %p3205_p1 = scmp.lt.s32.totalorder %s3203_s3, %s3196_s16 }
  0xbb   : > { %p3199_p12 = pnand %p3197_p10, %p3506_p13 }
  0xbc   : > { %p3206_p2 = por %p3205_p1, %p3204_p9 }
  0xbd   : > { %p3200_p0 = pneg %p3199_p12 }
  0xbf   : > { %p3207_p3 = pnand %p3206_p2, %p3200_p0 }
  0xc1   : > { %3210 = shalt.err (!%p3207_p3)
}
  0xc2   : > { %2929 = dma.hbm_to_vmem [thread:$0]  (!%p3490_p11), %s4054_s12, 16, %s596_s27, [#allocation14]  }
  0xc3   : > { %s2492_s23 = sadd.s32 4294967294, %s3321_s4   ;;  %s3642_s24 = sadd.s32 1, %s3321_s4  }
  0xc4   : > { %s50_s26 = ssub.s32 %s3321_s4, %s3642_s24  ;;  %s53_s18 = sadd.s32 1, %s3317_s0 }
  0xc5   : > { %p51_p13 = scmp.eq.s32.totalorder %s50_s26, 0  ;;  %p60_p6 = scmp.ne.s32.totalorder %s3317_s0, %s3313_s29 }
  0xc6   : > { %p61_p8 = scmp.eq.s32.totalorder %s3321_s4, 0  ;;  %p66_p4 = scmp.ne.s32.totalorder %s3313_s29, %s3309_s28 }
  0xc7   : > { %s3653_s15 = scalar_select %p51_p13, %s3317_s0, %s53_s18  }
  0xc8   : > { %p3655_p5 = por %p61_p8, %p60_p6  ;;  %p4104_p7 = scmp.eq.s32.totalorder %s3474_s5, 0 }
  0xc9   : > { %p494_p10 = scmp.eq.s32.totalorder %s3474_s5, 1  ;;  %p500_p12 = scmp.eq.s32.totalorder %s2492_s23, 1 }
  0xca   : > { %p3661_p11 = por %p4104_p7, %p66_p4  ;;  %p2944_p0 = scmp.lt.s32.totalorder %s3321_s4, 2 }
  0xcb   : > { %s630_s21 = sand.u32 1, %s3317_s0   ;;  %p3668_p9 = por %p494_p10, %p60_p6 }
  0xcc   : > { %p3672_p1 = por %p500_p12, %p66_p4  ;;  %s2501_s13 = sshll.u32 %s630_s21, 3 }
  0xcd   : > { %s4106_s1 = scalar_select %p3668_p9, 1, 0 }
  0xce   : > { %s4107_s30 = scalar_select %p3672_p1, 1, 0 }
  0xcf   : > { %s2502_s25 = sshll.u32 %s3321_s4, 7  ;;  %s4108_s14 = sld [smem:[#allocation24_spill]] }
  0xd0   : > { %s634_s23 = scalar_lea.vmem [#allocation4], %s2501_s13  ;;  %p3686_p2 = pnand %p2944_p0, %p3655_p5 }
  0xd1   : > { %s641_s26 = sshll.u32 %s634_s23, 4  ;;  %s631_s7 = scalar_lea.sflag [#allocation5], %s630_s21  ;;  %s3682_s26 = int_to_ptr.vmem [resolvable:$true] %s641_s26 }
  0xd2   : > { %p3213_p13 = pneg %p3686_p2 }
  0xd5   : > { %s3680_s20 = scalar_lea.hbm %s4108_s14, %s2502_s25  ;;  %s3216_s16 = scalar_lea.hbm %s4108_s14, 256 }
  0xd6   : > { %s3211_s8 = scalar_lea.hbm %s3680_s20, 128  ;;  %p3217_p4 = scmp.lt.u32.totalorder %s3680_s20, %s4108_s14 }
  0xd7   : > { %p3212_p3 = scmp.ne.s32.totalorder %s3680_s20, %s3211_s8  ;;  %p3218_p5 = scmp.lt.u32.totalorder %s3216_s16, %s3211_s8 }
  0xd8   : > { %p3220_p10 = scmp.lt.u32.totalorder %s3211_s8, %s3680_s20 }
  0xd9   : > { %p3214_p6 = pnand %p3213_p13, %p3212_p3  ;;  %p3219_p7 = por %p3218_p5, %p3217_p4 }
  0xdb   : > { %p3215_p8 = pneg %p3214_p6  ;;  %p3221_p12 = por %p3220_p10, %p3219_p7 }
  0xdd   : > { %p3222_p0 = pnand %p3221_p12, %p3215_p8 }
  0xdf   : > { %3225 = shalt.err (!%p3222_p0)
}
  0xe0   : > { %s3226_s21 = scalar_lea.vmem %s3682_s26, 128  ;;  %s3332_s23 = smov [#allocation4]  }
  0xe1   : > { %p3227_p3 = scmp.ne.s32.totalorder %s3682_s26, %s3226_s21  ;;  %s3231_s13 = sshll.u32 %s3332_s23, 4  ;;  %s3232_s13 = int_to_ptr.vmem [resolvable:$false] %s3231_s13 }
  0xe2   : > { %s3233_s25 = scalar_lea.vmem %s3232_s13, 256  ;;  %p3234_p9 = scmp.lt.s32.totalorder %s3682_s26, %s3232_s13 }
  0xe3   : > { %p3229_p6 = pnand %p3227_p3, %p3213_p13  ;;  %p3235_p4 = scmp.lt.s32.totalorder %s3233_s25, %s3226_s21 }
  0xe5   : > { %p3230_p1 = pneg %p3229_p6  ;;  %p3236_p5 = por %p3235_p4, %p3234_p9 }
  0xe7   : > { %p3237_p7 = pnand %p3236_p5, %p3230_p1 }
  0xe9   : > { %3240 = shalt.err (!%p3237_p7)
}
  0xea   : > { %2933 = dma.hbm_to_vmem [thread:$0]  (!%p3686_p2), %s3680_s20, 128, %s3682_s26, %s631_s7  }
  0xeb   : > { %p4110_p8 = scmp.ne.s32.totalorder %s4095_s22, 0 }
  0xec   : > { %s3718_s8 = sand.u32 (!%p4110_p8), 1, %s3313_s29  }
  0xed   : > { %658 = sbr.rel (%p4110_p8) target bundleno = 4882 (0x1312), region = 100  ;;  %s4074_s16 = sshll.u32 (!%p4110_p8), %s3718_s8, 3 }
  0xee   : > { %s661_s2 = scalar_lea.sflag (!%p4110_p8), [#allocation5], %s3718_s8  ;;  %s664_s3 = scalar_lea.vmem (!%p4110_p8), [#allocation4], %s4074_s16 }
  0xf4   : > { %3288 = dma.done.wait (%p3661_p11), %s661_s2, 128  }
  0xf5   : > { %3290 = vsyncadd (%p3661_p11), %s661_s2, 4294967168  ;;  %p4111_p9 = scmp.eq.s32.totalorder %s3474_s5, 0 }
  0xf7   : > { %3292 = dma.done.wait (%p4111_p9), [#allocation8], 1024   ;;  %p4112_p1 = pmov %p4111_p9 }
  0xf9   : > { %3294 = vsyncadd (%p4112_p1), [#allocation8], 4294966272  ;;  %p4113_p2 = pmov %p4112_p1 }
  0xfa   : > { %p4114_p13 = pmov %p4112_p1 }
  0xfb   : > { %3296 = dma.done.wait (%p4113_p2), [#allocation11], 1024  }
  0xfc   : > { %3298 = vsyncadd (%p4114_p13), [#allocation11], 4294966272  ;;  %p4115_p10 = pmov %p4112_p1 }
  0xfd   : > { %p4116_p12 = pmov %p4112_p1 }
  0xfe   : > { %3300 = dma.done.wait (%p4115_p10), [#allocation14], 32  }
  0xff   : > { %3302 = vsyncadd (%p4116_p12), [#allocation14], 4294967264  ;;  %v3333_v0 = vmov 0.0|0.0   ;;  %vm3334_vm0 = vmmov 0   ;;  %v3335_v1 = vmov 0.0   ;;  %s4117_s27 = sld [smem:[#allocation26_spill]]  ;;  %v758_v30 = vlaneseq }
 0x100   : > { %2797 = vmatprep.subr.bf16.mxu1 %v3333_v0  ;;  %2639 = vmatprep.mubr.msk.f32.mxu1 %vm3334_vm0, %v3335_v1  ;;  %s4118_s7 = sld [smem:[#allocation27_spill]]  ;;  %v3765_v10 = vld [vmem:[%s664_s3] sm:$0xff]  ;;  %vm770_vm1 = vcmask 261120   ;;  %s4119_s25 = sld [smem:[#allocation28_spill]]  ;;  %vm993_vm2 = vcmask 130048   ;;  %vm1071_vm4 = vcmask 64512  }
 0x101   : > { %2809 = vmatprep.subr.bf16.mxu0 %v3333_v0  ;;  %2661 = vmatprep.mubr.msk.f32.mxu0 %vm3334_vm0, %v3335_v1  ;;  %s3336_s23 = smov 112   ;;  %v759_v31 = vshrl.u32 %v758_v30, 7  ;;  %v3815_v32 = vand.u32 127, %v758_v30  ;;  %s4120_s6 = sld [smem:[#allocation29_spill]]  ;;  %vm3867_vm5 = vmpackc.low %vm993_vm2, %vm993_vm2  ;;  %vm1758_vm7 = vcmask 80896   ;;  %vm1773_vm8 = vcmask 1041408  }
 0x102   : > { %s3337_s3 = smov 16   ;;  %p750_p11 = scmp.lt.s32.totalorder %s3474_s5, 1  ;;  %vm3338_vm9 = vmmov 1   ;;  %vm2234_vm11 = vcmask 523264  }
 0x103   : > { %vm762_vm3 = vcmp.le.s32.totalorder %v3815_v32, %v759_v31  ;;  %s4121_s26 = sld [smem:[#allocation25_spill]]  ;;  %vm3892_vm10 = vmpackc.low %vm1773_vm8, %vm3338_vm9  ;;  %s4129_s20 = sld [smem:[#allocation35_spill]] }
 0x104   : > { %s751_s13 = scalar_select %p750_p11, %s3474_s5, 1 }
 0x105   : > { %v766_v2 = vld [vmem:[%s4117_s27] sm:$0xff]  ;;  %v767_v3 = vld [vmem:[%s4117_s27 + $0x8] sm:$0xff]  ;;  %v768_v4 = vld [vmem:[%s4117_s27 + $0x10] sm:$0xff]  ;;  %s763_s21 = sld [smem:[#allocation3 + %s3474_s5]]  ;;  %p4136_p3 = scmp.ne.s32.totalorder %s4106_s1, 0 }
 0x106   : > { %v2798_v5 = vpack.c.bf16 %v767_v3, %v766_v2  ;;  %v769_v6 = vld [vmem:[%s4117_s27 + $0x18] sm:$0xff]  ;;  %v845_v8 = vld [vmem:[%s4118_s7] sm:$0xff]  ;;  %v846_v9 = vld [vmem:[%s4118_s7 + $0x8] sm:$0xff]  ;;  %s2554_s2 = sshll.u32 %s751_s13, 4  ;;  %s4128_s13 = sld [smem:[#allocation34_spill]] }
 0x107   : > { %v2801_v7 = vpack.c.bf16 %v769_v6, %v768_v4  ;;  %v2804_v11 = vpack.c.bf16 %v846_v9, %v845_v8  ;;  %v847_v12 = vld [vmem:[%s4118_s7 + $0x10] sm:$0xff]  ;;  %v848_v13 = vld [vmem:[%s4118_s7 + $0x18] sm:$0xff]  ;;  %v919_v15 = vld [vmem:[%s4119_s25] sm:$0xff]  ;;  %s4135_s9 = sld [smem:[#allocation40_spill]] }
 0x108   : > { %2799 = vmatpush3.bf16.msra.mxu1 %v2798_v5  ;;  %v2807_v14 = vpack.c.bf16 %v848_v13, %v847_v12  ;;  %v920_v16 = vld [vmem:[%s4119_s25 + $0x8] sm:$0xff]  ;;  %v921_v17 = vld [vmem:[%s4119_s25 + $0x10] sm:$0xff]  ;;  %v922_v19 = vld [vmem:[%s4119_s25 + $0x18] sm:$0xff] }
 0x109   : > { %2800 = vmatprep.subr.bf16.mxu1 %v3333_v0  ;;  %v2810_v18 = vpack.c.bf16 %v920_v16, %v919_v15  ;;  %v2813_v20 = vpack.c.bf16 %v922_v19, %v921_v17  ;;  %v1328_v58 = vld [vmem:[%s4120_s6] sm:$0xff]  ;;  %v1329_v59 = vld [vmem:[%s4120_s6 + $0x8] sm:$0xff]  ;;  %v1330_v60 = vld [vmem:[%s4120_s6 + $0x10] sm:$0xff]  ;;  %s754_s18 = scalar_lea.vmem %s4121_s26, %s2554_s2  ;;  %s4134_s2 = sshll.u32 %s3718_s8, 3 }
 0x10a   : > { %v2816_v61 = vpack.c.bf16 %v1329_v59, %v1328_v58  ;;  %v1331_v62 = vld [vmem:[%s4120_s6 + $0x18] sm:$0xff]  ;;  %s749_s22 = scalar_lea.vmem [#allocation16], %s4134_s2  ;;  %s2340_s26 = scalar_lea.sflag [#allocation6], %s3718_s8 }
 0x10b   : > { %2811 = vmatpush3.bf16.msra.mxu0 %v2810_v18  ;;  %v2819_v63 = vpack.c.bf16 %v1331_v62, %v1330_v60  ;;  %v1514_v18 = vld [vmem:[#allocation9] sm:$0xff]  ;;  %v1515_v19 = vld [vmem:[#allocation9 + $0x8] sm:$0xff] }
 0x10c   : > { %2802 = vmatpush3.bf16.msra.mxu1 %v2801_v7  ;;  %2812 = vmatprep.subr.bf16.mxu0 %v3333_v0 }
 0x10d   : > { %2803 = vmatprep.subr.bf16.mxu1 %v3333_v0 }
 0x10f   : > { %2640 = vmatmul.mubr.msk.f32.vlgmr.msra.gmra.mrb[0].mxu1 %vm770_vm1, %v3765_v10  ;;  %2814 = vmatpush3.bf16.msra.mxu0 %v2813_v20  ;;  %v2827_v20 = vpack.c.bf16 %v1515_v19, %v1514_v18 }
 0x110   : > { %2805 = vmatpush3.bf16.msra.mxu1 %v2804_v11  ;;  %2650 = vmatprep.mubr.msk.f32.mxu1 %vm3334_vm0, %v3335_v1 }
 0x111   : > { %2806 = vmatprep.subr.bf16.mxu1 %v3333_v0  ;;  %2674 = vmatprep.subr.mxu0 %v3335_v1 }
 0x112   : > { %2662 = vmatmul.mubr.msk.f32.vlgmr.msra.gmra.mrb[0].mxu0 %vm770_vm1, %v3765_v10 }
 0x113   : > { %2676 = vmatprep.mubr.msk.f32.mxu0 %vm3334_vm0, %v3335_v1 }
 0x114   : > { %2808 = vmatpush3.bf16.msra.mxu1 %v2807_v14 }
 0x115   : > { %2664 = vmatprep.subr.mxu1 %v3335_v1 }
 0x117   : > { %2651 = vmatmul.mubr.msk.f32.vlgmr.msra.gmra.mrb[2].mxu1 %vm770_vm1, %v3765_v10 }
 0x118   : > { %2666 = vmatprep.mubr.msk.f32.mxu1 %vm3334_vm0, %v3335_v1 }
 0x1e2   : > { %v840_v21 = vpop.f32.mrb[0].mxu1 }
 0x1e3   : > { %v2641_v22 = vpop.f32.mrb[1].mxu1  ;;  %v844_v25 = vmul.f32 0.25, %v840_v21  ;;  %v1516_v21 = vld [vmem:[#allocation9 + $0x10] sm:$0xff] }
 0x1e5   : > { %v989_v26 = vpop.f32.mrb[0].mxu0 }
 0x1e6   : > { %v2663_v27 = vpop.f32.mrb[1].mxu0 }
 0x1ea   : > { %v915_v23 = vpop.f32.mrb[2].mxu1 }
 0x1eb   : > { %1158 = vrot.lane.b32.xlu0 %v915_v23, %s3336_s23  ;;  %v2652_v24 = vpop.f32.mrb[3].mxu1  ;;  %2665 = vmatpush3.xpose.msk.msra.mxu1 %vm993_vm2, %v915_v23  ;;  %v756_v23 = vld [vmem:[%s754_s18] sm:$0xff] }
 0x1ec   : > { %2669 = vmatprep.subr.mxu1 %v3335_v1  ;;  %v757_v24 = vld [vmem:[%s754_s18 + $0x8] sm:$0x3] }
 0x1ee   : > { %2667 = vmatmul.mubr.msk.f32.vlgmr.msra.gmra.mrb[4].mxu1 %vm993_vm2, %v844_v25 }
 0x1ef   : > { %1156 = vrot.lane.b32.xlu0 %v844_v25, %s3336_s23  ;;  %2671 = vmatprep.mubr.msk.f32.mxu1 %vm3334_vm0, %v3335_v1  ;;  %v1436_v25 = vld [vmem:[#allocation7] sm:$0xff] }
 0x1f0   : > { %2670 = vmatpush3.msra.mxu1 %v989_v26 }
 0x1f1   : > { %2679 = vmatprep.subr.mxu1 %v3335_v1 }
 0x25d   : > { %v1159_v28 = vpop.permute.xlu0 %1158 }
 0x25e   : > { %2675 = vmatpush3.xpose.msk.msra.mxu0 %vm993_vm2, %v1159_v28  ;;  %v1438_v28 = vld [vmem:[#allocation7 + $0x10] sm:$0xff] }
 0x25f   : > { %2815 = vmatprep.subr.bf16.mxu0 %v3333_v0 }
 0x261   : > { %v1157_v29 = vpop.permute.xlu0 %1156 }
 0x262   : > { %2677 = vmatmul.mubr.msk.f32.vlgmr.msra.gmra.mrb[2].mxu0 %vm993_vm2, %v1157_v29  ;;  %v1439_v29 = vld [vmem:[#allocation7 + $0x18] sm:$0xff] }
 0x263   : > { %2692 = vmatprep.mubr.msk.f32.mxu0 %vm3334_vm0, %v3335_v1  ;;  %2817 = vmatpush3.bf16.msra.mxu0 %v2816_v61  ;;  %v2825_v30 = vpack.c.bf16 %v1439_v29, %v1438_v28 }
 0x264   : > { %2818 = vmatprep.subr.bf16.mxu0 %v3333_v0 }
 0x267   : > { %2820 = vmatpush3.bf16.msra.mxu0 %v2819_v63 }
 0x268   : > { %2828 = vmatprep.subr.bf16.mxu0 %v2827_v20 }
 0x2c1   : > { %v1066_v33 = vpop.f32.mrb[4].mxu1 }
 0x2c2   : > { %v1070_v34 = vsel %vm762_vm3, %v1066_v33, -1000000.0  ;;  %v2668_v35 = vpop.f32.mrb[5].mxu1 }
 0x2c3   : > { %v1072_v36 = vsel %vm1071_vm4, %v1070_v34, -inf }
 0x2c4   : > { %1073 = vmax.xlane.f32.xlu1 %v1072_v36  ;;  %v2524_v36 = vld [vmem:[#allocation13] ss:$0 sm:$0xff] }
 0x335   : > { %v1230_v37 = vpop.f32.mrb[2].mxu0 }
 0x336   : > { %v1234_v38 = vsel %vm762_vm3, %v1230_v37, -1000000.0  ;;  %v2678_v39 = vpop.f32.mrb[3].mxu0 }
 0x337   : > { %v1235_v40 = vsel %vm1071_vm4, %v1234_v38, -inf }
 0x338   : > { %1236 = vmax.xlane.f32.xlu1 %v1235_v40 }
 0x351   : > { %v1074_v41 = vpop.xlane.xlu1 %1073 }
 0x352   : > { %v1075_v42 = vsub.f32 %v1070_v34, %v1074_v41 }
 0x354   : > { %v1076_v43 = vmul.f32 1.442695, %v1075_v42 }
 0x356   : > { %3009 = vpow2.f32 %v1076_v43 }
 0x360   : > { %v3010_v44 = vpop.eup %3009 }
 0x361   : > { %v1078_v45 = vsel %vm1071_vm4, %v3010_v44, 0.0 }
 0x362   : > { %1079 = vadd.xlane.f32.xlu0 %v1078_v45 }
 0x3c5   : > { %v1237_v46 = vpop.xlane.xlu1 %1236 }
 0x3c6   : > { %v1238_v47 = vsub.f32 %v1234_v38, %v1237_v46  ;;  %v2525_v38 = vld [vmem:[#allocation15] ss:$0 sm:$0xff] }
 0x3c8   : > { %v1239_v48 = vmul.f32 1.442695, %v1238_v47 }
 0x3ca   : > { %3011 = vpow2.f32 %v1239_v48 }
 0x3d4   : > { %v3012_v49 = vpop.eup %3011 }
 0x3d5   : > { %v1241_v50 = vsel %vm1071_vm4, %v3012_v49, 0.0 }
 0x3d6   : > { %1242 = vadd.xlane.f32.xlu1 %v1241_v50  ;;  %v1600_v50 = vld [vmem:[#allocation10 + $0x8] sm:$0xff] }
 0x3e7   : > { %1247 = vrot.lane.b32.xlu1 %v989_v26, %s3336_s23  ;;  %v1437_v26 = vld [vmem:[#allocation7 + $0x8] sm:$0xff] }
 0x3e8   : > { %v2822_v27 = vpack.c.bf16 %v1437_v26, %v1436_v25 }
 0x3ef   : > { %v1080_v51 = vpop.xlane.xlu0 %1079 }
 0x3f0   : > { %3013 = vrcp.f32 %v1080_v51  ;;  %v1601_v51 = vld [vmem:[#allocation10 + $0x10] sm:$0xff] }
 0x3fa   : > { %v3014_v52 = vpop.eup %3013 }
 0x3fb   : > { %v1082_v53 = vmul.f32 %v3014_v52, %v3010_v44 }
 0x3fd   : > { %2672 = vmatmul.mubr.msk.f32.vlgmr.msra.gmra.mrb[6].mxu1 %vm1071_vm4, %v1082_v53  ;;  %v1602_v53 = vld [vmem:[#allocation10 + $0x18] sm:$0xff] }
 0x3fe   : > { %2681 = vmatprep.mubr.msk.f32.mxu1 %vm3334_vm0, %v3335_v1 }
 0x463   : > { %v1243_v54 = vpop.xlane.xlu1 %1242 }
 0x464   : > { %3015 = vrcp.f32 %v1243_v54  ;;  %v2839_v54 = vpack.c.bf16 %v1602_v53, %v1601_v51 }
 0x467   : > { %v1248_v55 = vpop.permute.xlu1 %1247 }
 0x468   : > { %2680 = vmatpush3.msra.mxu1 %v1248_v55  ;;  %v764_v55 = vstv %s763_s21  ;;  %s4132_s21 = sld [smem:[#allocation36_spill]] }
 0x469   : > { %2821 = vmatprep.subr.bf16.mxu1 %v3333_v0  ;;  %vm3884_vm6 = vcmp.lt.s32.totalorder %v3815_v32, %v764_v55  ;;  %v2134_v55 = vld [vmem:[%s4059_s17] sm:$0xff] }
 0x46e   : > { %v3016_v56 = vpop.eup %3015 }
 0x46f   : > { %v1245_v57 = vmul.f32 %v3016_v56, %v3012_v49  ;;  %v1599_v49 = vld [vmem:[#allocation10] sm:$0xff] }
 0x470   : > { %v2835_v52 = vpack.c.bf16 %v1600_v50, %v1599_v49  ;;  %v2136_v56 = vld [vmem:[%s4059_s17 + $0x10] sm:$0xff] }
 0x471   : > { %2682 = vmatmul.mubr.msk.f32.vlgmr.msra.gmra.mrb[8].mxu1 %vm1071_vm4, %v1245_v57 }
 0x472   : > { %2703 = vmatprep.mubr.msk.f32.mxu1 %vm3334_vm0, %v3335_v1  ;;  %2823 = vmatpush3.bf16.msra.mxu1 %v2822_v27 }
 0x473   : > { %2824 = vmatprep.subr.bf16.mxu1 %v3333_v0 }
 0x476   : > { %2826 = vmatpush3.bf16.msra.mxu1 %v2825_v30 }
 0x477   : > { %2836 = vmatprep.subr.bf16.mxu1 %v2835_v52 }
 0x4d0   : > { %v1152_v2 = vpop.f32.mrb[6].mxu1 }
 0x4d1   : > { %v2673_v3 = vpop.f32.mrb[7].mxu1 }
 0x544   : > { %v1319_v4 = vpop.f32.mrb[8].mxu1 }
 0x545   : > { %1324 = vrot.lane.b32.xlu1 %v1319_v4, %s3337_s3  ;;  %v2683_v5 = vpop.f32.mrb[9].mxu1 }
 0x5b7   : > { %v1325_v6 = vpop.permute.xlu1 %1324 }
 0x5b8   : > { %v1327_v7 = vsel %vm993_vm2, %v1152_v2, %v1325_v6 }
 0x5b9   : > { %2693 = vmatmul.mubr.msk.f32.vlgmr.msra.gmra.mrb[4].mxu0 %vm770_vm1, %v1327_v7 }
 0x5ba   : > { %2830 = vmatpush3.bf16.msra.mxu0 %v2827_v20  ;;  %2714 = vmatprep.mubr.msk.f32.mxu0 %vm770_vm1, %v756_v23 }
 0x68c   : > { %v1401_v8 = vpop.f32.mrb[4].mxu0 }
 0x68d   : > { %v1405_v9 = vadd.f32 %v1401_v8, %v3765_v10  ;;  %v2694_v11 = vpop.f32.mrb[5].mxu0  ;;  %v1517_v10 = vld [vmem:[#allocation9 + $0x18] sm:$0xff] }
 0x68e   : > { %v2831_v22 = vpack.c.bf16 %v1517_v10, %v1516_v21 }
 0x68f   : > { %v1408_v12 = vsel %vm770_vm1, %v1405_v9, 0.0 }
 0x690   : > { %1409 = vadd.xlane.f32.xlu1 %v1408_v12  ;;  %2832 = vmatprep.subr.bf16.mxu0 %v2831_v22 }
 0x691   : > { %2834 = vmatpush3.bf16.msra.mxu0 %v2831_v22 }
 0x692   : > { %2843 = vmatprep.subr.bf16.mxu0 %v3333_v0 }
 0x694   : > { %2715 = vmatmul.mubr.msk.f32.vlgmr.msra.gmra.mrb[6].mxu0 %vm770_vm1, %v757_v24 }
 0x695   : > { %2732 = vmatprep.mubr.msk.f32.mxu0 %vm3334_vm0, %v3335_v1 }
 0x71d   : > { %v1410_v13 = vpop.xlane.xlu1 %1409 }
 0x71e   : > { %v1412_v14 = vmul.f32 0.03125, %v1410_v13 }
 0x720   : > { %v1413_v15 = vsub.f32 %v1405_v9, %v1412_v14 }
 0x722   : > { %v1414_v16 = vmul.f32 %v1413_v15, %v1413_v15 }
 0x724   : > { %v1415_v17 = vsel %vm770_vm1, %v1414_v16, 0.0 }
 0x725   : > { %1416 = vadd.xlane.f32.xlu0 %v1415_v17 }
 0x767   : > { %v2716_v41 = vpop.f32.mrb[6].mxu0 }
 0x768   : > { %v1590_v42 = vpop.f32.mrb[7].mxu0 }
 0x769   : > { %v2999_v44 = vpack.i.bf16 %v2716_v41, %v1590_v42  ;;  %v2844_v45 = vpack.c.bf16 %v2716_v41, %v1590_v42 }
 0x76b   : > { %2846 = vmatpush3.bf16.xpose.msk.msra.mxu0 %vm3867_vm5, %v2844_v45 }
 0x76c   : > { %2855 = vmatprep.subr.bf16.mxu0 %v3333_v0 }
 0x7b2   : > { %v1417_v31 = vpop.xlane.xlu0 %1416 }
 0x7b3   : > { %v1418_v33 = vmul.f32 0.03125, %v1417_v31 }
 0x7b5   : > { %v1419_v34 = vadd.f32 1e-05, %v1418_v33 }
 0x7b7   : > { %3017 = vrsqrt.f32 %v1419_v34 }
 0x7c1   : > { %v3018_v35 = vpop.eup %3017 }
 0x7c2   : > { %v1421_v37 = vmul.f32 %v3018_v35, %v1413_v15  ;;  %v2027_v35 = vld [vmem:[#allocation12] sm:$0xff] }
 0x7c4   : > { %v1428_v39 = vmul.f32 %v2524_v36, %v1421_v37  ;;  %v2028_v36 = vld [vmem:[#allocation12 + $0x8] sm:$0xff]  ;;  %v2029_v37 = vld [vmem:[#allocation12 + $0x10] sm:$0xff] }
 0x7c6   : > { %v3860_v40 = vadd.f32 %v2525_v38, %v1428_v39  ;;  %v2860_v38 = vpack.c.bf16 %v2028_v36, %v2027_v35  ;;  %v2030_v39 = vld [vmem:[#allocation12 + $0x18] sm:$0xff] }
 0x7c7   : > { %v2863_v41 = vpack.c.bf16 %v2030_v39, %v2029_v37  ;;  %v2548_v37 = vld [vmem:[%s4132_s21] ss:$0 sm:$0xff] }
 0x7c8   : > { %2704 = vmatmul.mubr.msk.f32.vlgmr.msra.gmra.mrb[10].mxu1 %vm770_vm1, %v3860_v40 }
 0x7c9   : > { %2725 = vmatprep.mubr.msk.f32.mxu1 %vm770_vm1, %v756_v23  ;;  %2838 = vmatpush3.bf16.msra.mxu1 %v2835_v52 }
 0x7ca   : > { %2840 = vmatprep.subr.bf16.mxu1 %v2839_v54 }
 0x7cd   : > { %2842 = vmatpush3.bf16.msra.mxu1 %v2839_v54 }
 0x7ce   : > { %2847 = vmatprep.subr.bf16.mxu1 %v3333_v0 }
 0x7d0   : > { %2726 = vmatmul.mubr.msk.f32.vlgmr.msra.gmra.mrb[12].mxu1 %vm770_vm1, %v757_v24 }
 0x7d1   : > { %2739 = vmatprep.mubr.msk.f32.mxu1 %vm3334_vm0, %v3335_v1 }
 0x89b   : > { %v1509_v46 = vpop.f32.mrb[10].mxu1 }
 0x89c   : > { %v1513_v47 = vmul.f32 0.25, %v1509_v46  ;;  %v2705_v48 = vpop.f32.mrb[11].mxu1 }
 0x89e   : > { %1847 = vrot.lane.b32.xlu1 %v1513_v47, %s3336_s23  ;;  %2733 = vmatmul.mubr.msk.f32.vlgmr.msra.gmra.mrb[8].mxu0 %vm993_vm2, %v1513_v47 }
 0x89f   : > { %2753 = vmatprep.mubr.msk.f32.mxu0 %vm3334_vm0, %v3335_v1 }
 0x8a3   : > { %v2727_v32 = vpop.f32.mrb[12].mxu1 }
 0x8a4   : > { %v1669_v4 = vpop.f32.mrb[13].mxu1 }
 0x8a5   : > { %v3004_v5 = vpack.i.bf16 %v2727_v32, %v1669_v4  ;;  %v2848_v6 = vpack.c.bf16 %v2727_v32, %v1669_v4  ;;  %v2224_v32 = vld [vmem:[%s4061_s19 + $0x28] sm:$0xff] }
 0x8a7   : > { %2850 = vmatpush3.bf16.msk.msra.mxu1 %vm3892_vm10, %v2848_v6 }
 0x8a8   : > { %2851 = vmatprep.subr.bf16.mxu1 %v3333_v0 }
 0x910   : > { %v1848_v16 = vpop.permute.xlu1 %1847 }
 0x971   : > { %v1753_v57 = vpop.f32.mrb[8].mxu0 }
 0x972   : > { %v1757_v58 = vsel %vm3884_vm6, %v1753_v57, -1000000.0  ;;  %v2734_v59 = vpop.f32.mrb[9].mxu0  ;;  %v2137_v57 = vld [vmem:[%s4059_s17 + $0x18] sm:$0xff] }
 0x973   : > { %v1759_v60 = vsel %vm1758_vm7, %v1757_v58, -inf  ;;  %v2219_v59 = vld [vmem:[%s4061_s19] sm:$0xff] }
 0x974   : > { %1760 = vmax.xlane.f32.xlu0 %v1759_v60  ;;  %v2220_v60 = vld [vmem:[%s4061_s19 + $0x8] sm:$0xff] }
 0xa01   : > { %v1761_v61 = vpop.xlane.xlu0 %1760 }
 0xa02   : > { %v1762_v62 = vsub.f32 %v1757_v58, %v1761_v61  ;;  %v2869_v58 = vpack.c.bf16 %v2137_v57, %v2136_v56  ;;  %v2221_v61 = vld [vmem:[%s4061_s19 + $0x10] sm:$0xff] }
 0xa04   : > { %v1763_v63 = vmul.f32 1.442695, %v1762_v62  ;;  %v2872_v62 = vpack.c.bf16 %v2220_v60, %v2219_v59 }
 0xa06   : > { %3019 = vpow2.f32 %v1763_v63  ;;  %v2222_v63 = vld [vmem:[%s4061_s19 + $0x18] sm:$0xff] }
 0xa10   : > { %v3020_v2 = vpop.eup %3019 }
 0xa11   : > { %v1765_v3 = vsel %vm1758_vm7, %v3020_v2, 0.0 }
 0xa12   : > { %1766 = vadd.xlane.f32.xlu0 %v1765_v3  ;;  %v2223_v3 = vld [vmem:[%s4061_s19 + $0x20] sm:$0xff] }
 0xa13   : > { %v2878_v4 = vpack.c.bf16 %v2224_v32, %v2223_v3 }
 0xa28   : > { %3000 = vrot.lane.b32.xlu0 %v2999_v44, %s3336_s23 }
 0xa9f   : > { %v1767_v8 = vpop.xlane.xlu0 %1766 }
 0xaa0   : > { %3021 = vrcp.f32 %v1767_v8 }
 0xaa3   : > { %v3001_v9 = vpop.permute.xlu0 %3000 }
 0xaa4   : > { %v3003_v11 = vunpack.i.h.bf16 %v3001_v9  ;;  %v3002_v12 = vunpack.i.l.bf16 %v3001_v9  ;;  %v2542_v9 = vld [vmem:[%s4128_s13] ss:$0 sm:$0xff]  ;;  %s4130_s13 = sld [smem:[#allocation38_spill]] }
 0xaa6   : > { %v2852_v15 = vpack.c.bf16 %v3003_v11, %v3002_v12  ;;  %v2543_v12 = vld [vmem:[%s4129_s20] ss:$0 sm:$0xff]  ;;  %s4131_s20 = sld [smem:[#allocation39_spill]] }
 0xaaa   : > { %v3022_v13 = vpop.eup %3021 }
 0xaab   : > { %v1769_v14 = vmul.f32 %v3022_v13, %v3020_v2  ;;  %v2875_v2 = vpack.c.bf16 %v2222_v63, %v2221_v61 }
 0xaad   : > { %2740 = vmatmul.mubr.msk.f32.vlgmr.msra.gmra.mrb[14].mxu1 %vm1758_vm7, %v1769_v14 }
 0xaae   : > { %2854 = vmatpush3.bf16.xpose.msk.msra.mxu1 %vm3867_vm5, %v2852_v15  ;;  %2746 = vmatprep.mubr.msk.f32.mxu1 %vm3334_vm0, %v3335_v1  ;;  %v2226_v15 = vld [vmem:[%s4061_s19 + $0x38] sm:$0xff] }
 0xaaf   : > { %2865 = vmatprep.subr.bf16.mxu1 %v3333_v0 }
 0xab5   : > { %2747 = vmatmul.mubr.msk.f32.vlgmr.msra.gmra.mrb[16].mxu1 %vm993_vm2, %v1848_v16 }
 0xab6   : > { %2775 = vmatprep.mubr.msk.f32.mxu1 %vm3334_vm0, %v3335_v1 }
 0xb80   : > { %v1843_v17 = vpop.f32.mrb[14].mxu1 }
 0xb81   : > { %v2741_v18 = vpop.f32.mrb[15].mxu1 }
 0xb88   : > { %v1925_v19 = vpop.f32.mrb[16].mxu1 }
 0xb89   : > { %v1929_v20 = vsel %vm3884_vm6, %v1925_v19, -1000000.0  ;;  %v2748_v21 = vpop.f32.mrb[17].mxu1 }
 0xb8a   : > { %v1930_v10 = vsel %vm1758_vm7, %v1929_v20, -inf }
 0xb8b   : > { %1931 = vmax.xlane.f32.xlu0 %v1930_v10  ;;  %v2546_v10 = vld [vmem:[%s4131_s20] ss:$0 sm:$0xff]  ;;  %s2353_s20 = sshll.u32 %s749_s22, 4  ;;  %s3999_s20 = int_to_ptr.vmem [resolvable:$true] %s2353_s20 }
 0xb8c   : > { %s3241_s18 = scalar_lea.vmem %s3999_s20, 128 }
 0xb8d   : > { %p3242_p0 = scmp.ne.s32.totalorder %s3999_s20, %s3241_s18 }
 0xb8f   : > { %p3243_p6 = pnand %p3242_p0, %p4136_p3 }
 0xb91   : > { %p3244_p4 = pneg %p3243_p6 }
 0xba1   : > { %3005 = vrot.lane.b32.xlu0 %v3004_v5, %s3336_s23 }
 0xc18   : > { %v1932_v22 = vpop.xlane.xlu0 %1931 }
 0xc19   : > { %v1933_v23 = vsub.f32 %v1929_v20, %v1932_v22 }
 0xc1b   : > { %v1934_v24 = vmul.f32 1.442695, %v1933_v23 }
 0xc1c   : > { %v3006_v25 = vpop.permute.xlu0 %3005 }
 0xc1d   : > { %3023 = vpow2.f32 %v1934_v24  ;;  %v3008_v26 = vunpack.i.h.bf16 %v3006_v25  ;;  %v3007_v27 = vunpack.i.l.bf16 %v3006_v25 }
 0xc1f   : > { %v2856_v28 = vpack.c.bf16 %v3008_v26, %v3007_v27 }
 0xc21   : > { %2858 = vmatpush3.bf16.msk.msra.mxu0 %vm3892_vm10, %v2856_v28 }
 0xc22   : > { %2859 = vmatprep.subr.bf16.mxu0 %v3333_v0 }
 0xc27   : > { %v3024_v29 = vpop.eup %3023 }
 0xc28   : > { %v1936_v30 = vsel %vm1758_vm7, %v3024_v29, 0.0 }
 0xc29   : > { %1937 = vadd.xlane.f32.xlu1 %v1936_v30 }
 0xcb6   : > { %v1938_v31 = vpop.xlane.xlu1 %1937 }
 0xcb7   : > { %3025 = vrcp.f32 %v1938_v31 }
 0xcc1   : > { %v3026_v33 = vpop.eup %3025 }
 0xcc2   : > { %v1940_v34 = vmul.f32 %v3026_v33, %v3024_v29 }
 0xcc4   : > { %2754 = vmatmul.mubr.msk.f32.vlgmr.msra.gmra.mrb[10].mxu0 %vm1758_vm7, %v1940_v34 }
 0xcc5   : > { %2764 = vmatprep.mubr.msk.f32.mxu0 %vm3334_vm0, %v3335_v1  ;;  %2861 = vmatpush3.bf16.msra.mxu0 %v2860_v38 }
 0xcc6   : > { %2862 = vmatprep.subr.bf16.mxu0 %v3333_v0 }
 0xcc9   : > { %2864 = vmatpush3.bf16.msra.mxu0 %v2863_v41 }
 0xcca   : > { %2871 = vmatprep.subr.bf16.mxu0 %v3333_v0 }
 0xd97   : > { %v2018_v42 = vpop.f32.mrb[10].mxu0 }
 0xd98   : > { %2023 = vrot.lane.b32.xlu1 %v2018_v42, %s3337_s3  ;;  %v2755_v43 = vpop.f32.mrb[11].mxu0  ;;  %s4133_s3 = sld [smem:[#allocation37_spill]] }
 0xd9e   : > { %v2549_v39 = vld [vmem:[%s4133_s3] ss:$0 sm:$0xff] }
 0xe0a   : > { %v2024_v44 = vpop.permute.xlu1 %2023 }
 0xe0b   : > { %v2026_v45 = vsel %vm993_vm2, %v1843_v17, %v2024_v44  ;;  %v2544_v17 = vld [vmem:[%s4130_s13] ss:$0 sm:$0xff]  ;;  %s2551_s13 = sshll.u32 %s3474_s5, 7  ;;  %s3339_s5 = smov [#allocation16]  }
 0xe0c   : > { %2765 = vmatmul.mubr.msk.f32.vlgmr.msra.gmra.mrb[12].mxu0 %vm770_vm1, %v2026_v45  ;;  %s3997_s10 = scalar_lea.hbm %s4135_s9, %s2551_s13  ;;  %s3245_s21 = sshll.u32 %s3339_s5, 4  ;;  %s3246_s21 = int_to_ptr.vmem [resolvable:$false] %s3245_s21 }
 0xe0d   : > { %2794 = vmatprep.mubr.msk.f32.mxu0 %vm3334_vm0, %v3335_v1  ;;  %v2135_v1 = vld [vmem:[%s4059_s17 + $0x8] sm:$0xff]  ;;  %2873 = vmatpush3.bf16.msra.mxu0 %v2872_v62  ;;  %s3247_s23 = scalar_lea.vmem %s3246_s21, 256  ;;  %p3248_p5 = scmp.lt.s32.totalorder %s3999_s20, %s3246_s21 }
 0xe0e   : > { %2874 = vmatprep.subr.bf16.mxu0 %v3333_v0  ;;  %p3249_p7 = scmp.lt.s32.totalorder %s3247_s23, %s3241_s18 }
 0xe10   : > { %p3250_p8 = por %p3249_p7, %p3248_p5 }
 0xe11   : > { %2876 = vmatpush3.bf16.msra.mxu0 %v2875_v2 }
 0xe12   : > { %2877 = vmatprep.subr.bf16.mxu0 %v3333_v0  ;;  %p3251_p9 = pnand %p3250_p8, %p3244_p4 }
 0xe15   : > { %2879 = vmatpush3.bf16.msra.mxu0 %v2878_v4 }
 0xe16   : > { %2880 = vmatprep.subr.bf16.mxu0 %v3333_v0 }
 0xedf   : > { %v2100_v46 = vpop.f32.mrb[12].mxu0 }
 0xee0   : > { %v2104_v47 = vadd.f32 %v2100_v46, %v3860_v40  ;;  %v2766_v48 = vpop.f32.mrb[13].mxu0  ;;  %v2866_v40 = vpack.c.bf16 %v2135_v1, %v2134_v55 }
 0xee2   : > { %v2107_v49 = vsel %vm770_vm1, %v2104_v47, 0.0  ;;  %2867 = vmatpush3.bf16.msra.mxu1 %v2866_v40 }
 0xee3   : > { %2108 = vadd.xlane.f32.xlu0 %v2107_v49  ;;  %2868 = vmatprep.subr.bf16.mxu1 %v3333_v0  ;;  %v2225_v0 = vld [vmem:[%s4061_s19 + $0x30] sm:$0xff] }
 0xee4   : > { %v2881_v16 = vpack.c.bf16 %v2226_v15, %v2225_v0 }
 0xee6   : > { %2870 = vmatpush3.bf16.msra.mxu1 %v2869_v58  ;;  %2882 = vmatpush3.bf16.msra.mxu0 %v2881_v16 }
 0xf70   : > { %v2109_v50 = vpop.xlane.xlu0 %2108 }
 0xf71   : > { %v2110_v51 = vmul.f32 0.03125, %v2109_v50 }
 0xf73   : > { %v2111_v52 = vsub.f32 %v2104_v47, %v2110_v51 }
 0xf75   : > { %v2112_v53 = vmul.f32 %v2111_v52, %v2111_v52 }
 0xf77   : > { %v2113_v54 = vsel %vm770_vm1, %v2112_v53, 0.0 }
 0xf78   : > { %2114 = vadd.xlane.f32.xlu1 %v2113_v54 }
0x1005   : > { %v2115_v5 = vpop.xlane.xlu1 %2114 }
0x1006   : > { %v2116_v6 = vmul.f32 0.03125, %v2115_v5 }
0x1008   : > { %v2117_v7 = vadd.f32 1e-05, %v2116_v6 }
0x100a   : > { %3027 = vrsqrt.f32 %v2117_v7 }
0x1014   : > { %v3028_v8 = vpop.eup %3027 }
0x1015   : > { %v2119_v11 = vmul.f32 %v3028_v8, %v2111_v52 }
0x1017   : > { %v2126_v13 = vmul.f32 %v2542_v9, %v2119_v11 }
0x1019   : > { %v2133_v14 = vadd.f32 %v2543_v12, %v2126_v13 }
0x101b   : > { %2776 = vmatmul.mubr.msk.f32.vlgmr.msra.gmra.mrb[18].mxu1 %vm770_vm1, %v2133_v14 }
0x10ee   : > { %v2214_v18 = vpop.f32.mrb[18].mxu1 }
0x10ef   : > { %v2215_v19 = vadd.f32 %v2544_v17, %v2214_v18  ;;  %v2777_v20 = vpop.f32.mrb[19].mxu1 }
0x10f1   : > { %v2218_v21 = vmax.f32 %v2215_v19, 0.0 }
0x10f3   : > { %2795 = vmatmul.mubr.msk.f32.vlgmr.msra.gmra.mrb[14].mxu0 %vm2234_vm11, %v2218_v21 }
0x11c6   : > { %v2304_v22 = vpop.f32.mrb[14].mxu0 }
0x11c7   : > { %v2305_v23 = vadd.f32 %v2546_v10, %v2304_v22  ;;  %v2796_v24 = vpop.f32.mrb[15].mxu0 }
0x11c9   : > { %v2308_v25 = vadd.f32 %v2305_v23, %v2133_v14 }
0x11cb   : > { %v2311_v26 = vsel %vm770_vm1, %v2308_v25, 0.0 }
0x11cc   : > { %2312 = vadd.xlane.f32.xlu0 %v2311_v26 }
0x1259   : > { %v2313_v27 = vpop.xlane.xlu0 %2312 }
0x125a   : > { %v2314_v28 = vmul.f32 0.03125, %v2313_v27 }
0x125c   : > { %v2315_v29 = vsub.f32 %v2308_v25, %v2314_v28 }
0x125e   : > { %v2316_v30 = vmul.f32 %v2315_v29, %v2315_v29 }
0x1260   : > { %v2317_v31 = vsel %vm770_vm1, %v2316_v30, 0.0 }
0x1261   : > { %2318 = vadd.xlane.f32.xlu0 %v2317_v31 }
0x12ee   : > { %v2319_v33 = vpop.xlane.xlu0 %2318 }
0x12ef   : > { %v2320_v34 = vmul.f32 0.03125, %v2319_v33 }
0x12f1   : > { %v2321_v35 = vadd.f32 1e-05, %v2320_v34 }
0x12f3   : > { %3029 = vrsqrt.f32 %v2321_v35 }
0x12fd   : > { %v3030_v36 = vpop.eup %3029 }
0x12fe   : > { %v2323_v38 = vmul.f32 %v3030_v36, %v2315_v29 }
0x1300   : > { %v2330_v41 = vmul.f32 %v2548_v37, %v2323_v38 }
0x1302   : > { %v2337_v42 = vadd.f32 %v2549_v39, %v2330_v41 }
0x1304   : > { %2338 = vst.msk [vmem:[%s749_s22] sm:$0xff] %vm770_vm1, %v2337_v42 }
0x1305   : > { %3254 = shalt.err (!%p3251_p9)
}
0x1306   : > { %s3255_s6 = scalar_lea.hbm %s3997_s10, 128  ;;  %s3259_s16 = scalar_lea.hbm %s4135_s9, 256 }
0x1307   : > { %p3256_p1 = scmp.ne.s32.totalorder %s3997_s10, %s3255_s6  ;;  %p3260_p10 = scmp.lt.u32.totalorder %s3997_s10, %s4135_s9 }
0x1308   : > { %p3261_p12 = scmp.lt.u32.totalorder %s3259_s16, %s3255_s6  ;;  %p3263_p0 = scmp.lt.u32.totalorder %s3255_s6, %s3997_s10 }
0x1309   : > { %p3257_p2 = pnand %p3256_p1, %p4136_p3 }
0x130a   : > { %p3262_p11 = por %p3261_p12, %p3260_p10 }
0x130b   : > { %p3258_p13 = pneg %p3257_p2 }
0x130c   : > { %p3264_p6 = por %p3263_p0, %p3262_p11 }
0x130e   : > { %p3265_p4 = pnand %p3264_p6, %p3258_p13 }
0x1310   : > { %3268 = shalt.err (!%p3265_p4)
}
0x1311   : > { %2909 = dma.vmem_to_hbm [thread:$0]  (%p4136_p3), %s3999_s20, 128, %s3997_s10, %s2340_s26  }
0x1312 PF: > { %s2365_s2 = sand.u32 1, %s3309_s28   ;;  %p4137_p5 = scmp.ne.s32.totalorder %s4107_s30, 0 }
0x1313   : > { %p4138_p7 = scmp.ge.s32.totalorder %s3321_s4, 2  ;;  %s2366_s22 = scalar_lea.sflag [#allocation6], %s2365_s2 }
0x1315   : > { %p2935_p8 = pnand %p4138_p7, %p4137_p5 }
0x1317   : > { %3304 = dma.done.wait (!%p2935_p8), %s2366_s22, 128  }
0x1318   : > { %3306 = vsyncadd (!%p2935_p8), %s2366_s22, 4294967168  ;;  %p43_p9 = scmp.ge.s32.totalorder %s3642_s24, 4   ;;  %s4139_s28 = smov %s3313_s29 }
0x1319   : > { %s4140_s29 = smov %s3317_s0  ;;  %s4141_s0 = smov %s3653_s15 }
0x131a   : > { %s4142_s4 = smov %s3642_s24  ;;  %45 = sbr.rel (!%p43_p9) target bundleno = 38 (0x26), region = 172 }
0x1321   :  { %2371 = vsyncpa [#allocation5], 1 }
0x1322   :  { %2373 = vsyncpa [#allocation5 + $0x1], 1 }
0x1323   :  { %2374 = vsyncpa [#allocation8], 1 }
0x1324   :  { %2375 = vsyncpa [#allocation11], 1 }
0x1325   :  { %2376 = vsyncpa [#allocation14], 1 }
0x1326   :  { %2377 = vsyncpa [#allocation6], 1 }
0x1327   :  { %2379 = vsyncpa [#allocation6 + $0x1], 1 }

</bundles_post_ra>
